<compile_context>
chip_gen: v7x
topology: tpu7x:2x2x1
jax: 0.10.0
libtpu: 0.0.40
codegen_flags: <defaults>
</compile_context>

<pallas_src>
import functools

import jax
import jax.numpy as jnp
from jax.experimental import pallas as pl
from jax.experimental.pallas import tpu as pltpu

_NEG_INF = -1e30  # finite "minus infinity": avoids inf-inf NaNs in the online softmax


def _round_up(x, m):
    return (x + m - 1) // m * m


def _default_tile_pref():
    # 256-deep MXU on v6e/v7x, 128 on v5e and older generations.
    try:
        kind = jax.devices()[0].device_kind.lower()
    except Exception:
        return 128
    return 256 if ("v6" in kind or "v7" in kind) else 128


def _mha_kernel(xq_ref, xkv_ref, wqkv_ref, wfc_ref, o_ref,
                q_buf, kc_ref, vc_ref, m_ref, l_ref, acc_ref,
                *, n_heads, head_dim, hd_pad, kv_tile, seq_len, mask_keys,
                scale, mxu_dtype):
    # xq_ref:   (1, TQ, Dp)    query rows of x (constant across the kv axis)
    # xkv_ref:  (1, TK, Dp)    key/value rows of x (only consumed while qi == 0)
    # wqkv_ref: (Dp, 3*HDp)    fused, pre-transposed [Wq^T | Wk^T | Wv^T], VMEM resident
    # wfc_ref:  (HDp, Dp)      pre-transposed output projection, VMEM resident
    # o_ref:    (1, TQ, Dp)
    # q_buf:    (TQ, HDp)      scaled Q tile (mxu_dtype)
    # kc/vc:    (Sp, HDp)      projected K/V cache for the whole padded sequence (mxu_dtype)
    # m/l/acc:  (TQ, HDp) f32  online-softmax state, broadcast per head across its Dh lanes
    qi = pl.program_id(1)
    ki = pl.program_id(2)
    H, Dh = n_heads, head_dim
    TQ = q_buf.shape[0]
    TK = kv_tile
    off = pl.multiple_of(ki * TK, TK)

    # ---- project K/V for this kv tile once per batch (first q-tile), cache in VMEM ----
    @pl.when(qi == 0)
    def _():
        xkv = xkv_ref[0]                                                  # (TK, Dp)
        k = jnp.dot(xkv, wqkv_ref[:, hd_pad:2 * hd_pad],
                    preferred_element_type=jnp.float32)
        v = jnp.dot(xkv, wqkv_ref[:, 2 * hd_pad:3 * hd_pad],
                    preferred_element_type=jnp.float32)
        kc_ref[pl.ds(off, TK), :] = k.astype(kc_ref.dtype)
        vc_ref[pl.ds(off, TK), :] = v.astype(vc_ref.dtype)

    # ---- per-(batch, q-tile) init: project + scale Q once; reset online-softmax state ----
    @pl.when(ki == 0)
    def _():
        q = jnp.dot(xq_ref[0], wqkv_ref[:, 0:hd_pad],
                    preferred_element_type=jnp.float32)                   # (TQ, HDp) f32
        q_buf[...] = (q * scale).astype(q_buf.dtype)                      # scale folded into Q
        m_ref[...] = jnp.full_like(m_ref, _NEG_INF)
        l_ref[...] = jnp.zeros_like(l_ref)
        acc_ref[...] = jnp.zeros_like(acc_ref)

    q = q_buf[...]                                                        # (TQ, HDp) mxu_dtype
    k = kc_ref[pl.ds(off, TK), :]                                         # (TK, HDp) mxu_dtype
    v = vc_ref[pl.ds(off, TK), :]
    m_prev = m_ref[...]                                                   # (TQ, HDp) f32

    if mask_keys:  # S was padded up to the tile size: mask out-of-range keys
        key_pos = off + jax.lax.broadcasted_iota(jnp.int32, (TQ, TK), 1)
        valid = key_pos < seq_len

    # ---- online-softmax update.  Heads are static lane slices of the (.., HDp) slabs; the
    #      per-head partials are lane-concatenated into full-width arrays so the scratch state
    #      is updated with a single lane-dense load/store per tensor per kv step.
    # TODO(synk): block-diagonal head packing (fill the 128/256-deep MXU contraction) and a
    #             fori_loop for very large n_heads are left out for simplicity.
    m_cols, a_cols, l_cols, pv_cols = [], [], [], []
    for h in range(H):
        sl = slice(h * Dh, (h + 1) * Dh)
        s = jax.lax.dot_general(q[:, sl], k[:, sl], (((1,), (1,)), ((), ())),
                                preferred_element_type=jnp.float32)       # (TQ, TK) f32
        if mask_keys:
            s = jnp.where(valid, s, _NEG_INF)
        m_h_prev = m_prev[:, h * Dh:h * Dh + 1]                           # (TQ, 1)
        m_h = jnp.maximum(m_h_prev, jnp.max(s, axis=-1, keepdims=True))
        alpha_h = jnp.exp(m_h_prev - m_h)                                 # (TQ, 1)
        p = jnp.exp(s - m_h)                                              # f32 softmax math
        m_cols.append(jnp.broadcast_to(m_h, (TQ, Dh)))
        a_cols.append(jnp.broadcast_to(alpha_h, (TQ, Dh)))
        l_cols.append(jnp.broadcast_to(jnp.sum(p, axis=-1, keepdims=True), (TQ, Dh)))
        pv_cols.append(jnp.dot(p.astype(mxu_dtype), v[:, sl],
                               preferred_element_type=jnp.float32))       # (TQ, Dh) f32

    if hd_pad > H * Dh:
        # Padded lanes: keep acc at 0 and l >= 1 so the finalize reciprocal stays finite.
        pad = hd_pad - H * Dh
        m_cols.append(jnp.zeros((TQ, pad), jnp.float32))
        a_cols.append(jnp.zeros((TQ, pad), jnp.float32))
        l_cols.append(jnp.ones((TQ, pad), jnp.float32))
        pv_cols.append(jnp.zeros((TQ, pad), jnp.float32))

    m_new = jnp.concatenate(m_cols, axis=1)                               # (TQ, HDp)
    alpha = jnp.concatenate(a_cols, axis=1)
    l_add = jnp.concatenate(l_cols, axis=1)
    pv = jnp.concatenate(pv_cols, axis=1)

    l_ref[...] = alpha * l_ref[...] + l_add                               # one lane-dense RMW each
    acc_ref[...] = alpha * acc_ref[...] + pv
    m_ref[...] = m_new

    # ---- finalize: full-width normalize, output projection, lane-dense (padded) store ----
    @pl.when(ki == pl.num_programs(2) - 1)
    def _():
        l = l_ref[...]
        r = pl.reciprocal(l, approx=True)                                 # EUP slot
        r = r * (2.0 - l * r)                                             # one Newton step
        ctx = (acc_ref[...] * r).astype(mxu_dtype)                        # padded cols stay zero
        out = jnp.dot(ctx, wfc_ref[...], preferred_element_type=jnp.float32)
        o_ref[0] = out.astype(o_ref.dtype)


def mha_pallas(x, wq, wk, wv, wfc, *, n_heads, head_dim,
               mxu_dtype=jnp.bfloat16, tile=None):
    N, S, d = x.shape
    HD = n_heads * head_dim
    assert wq.shape == (HD, d) and wk.shape == (HD, d) and wv.shape == (HD, d)
    assert wfc.shape == (d, HD)

    d_pad = _round_up(d, 128)
    hd_pad = _round_up(HD, 128)

    # Tile selection: 256 on v6e/v7x, 128 on v5e/older; small S just rounds up to the sublane
    # packing (16 rows for bf16, 8 for f32).  S is padded to the tile; padded keys are masked.
    row_align = 8 if jnp.dtype(mxu_dtype).itemsize >= 4 else 16
    if tile is None:
        tile = _default_tile_pref()
        if S < tile:
            tile = _round_up(S, row_align)
    tile = _round_up(tile, row_align)
    TQ = TK = tile
    S_pad = _round_up(S, tile)
    n_q = S_pad // TQ
    n_kv = S_pad // TK
    scale = 1.0 / float(d) ** 0.5          # reference scales by model_dim, not head_dim

    # Fused, pre-transposed, zero-padded weights; cast once to the MXU operand dtype.
    wqkv_t = jnp.zeros((d_pad, 3 * hd_pad), dtype=mxu_dtype)
    wqkv_t = wqkv_t.at[:d, 0:HD].set(wq.T.astype(mxu_dtype))
    wqkv_t = wqkv_t.at[:d, hd_pad:hd_pad + HD].set(wk.T.astype(mxu_dtype))
    wqkv_t = wqkv_t.at[:d, 2 * hd_pad:2 * hd_pad + HD].set(wv.T.astype(mxu_dtype))
    wfc_t = jnp.zeros((hd_pad, d_pad), dtype=mxu_dtype)
    wfc_t = wfc_t.at[:HD, :d].set(wfc.T.astype(mxu_dtype))

    xp = x
    if S_pad != S or d_pad != d:
        xp = jnp.pad(x, ((0, 0), (0, S_pad - S), (0, d_pad - d)))
    xp = xp.astype(mxu_dtype)

    kernel = functools.partial(
        _mha_kernel, n_heads=n_heads, head_dim=head_dim, hd_pad=hd_pad,
        kv_tile=TK, seq_len=S, mask_keys=(S_pad != S), scale=scale, mxu_dtype=mxu_dtype)

    # VMEM budget (single-buffered resident weights + double-buffered x/out tiles + scratch).
    itm = jnp.dtype(mxu_dtype).itemsize
    out_itm = jnp.dtype(x.dtype).itemsize
    vmem_need = ((wqkv_t.size + wfc_t.size) * itm              # resident weights (single buf)
                 + 2 * (TQ + TK) * d_pad * itm                 # double-buffered x tiles
                 + 2 * TQ * d_pad * out_itm                    # double-buffered output tile
                 + (TQ + 2 * S_pad) * hd_pad * itm             # q_buf + K/V cache
                 + 3 * TQ * hd_pad * 4)                        # m / l / acc (f32)
    vmem_limit = int(min(max(vmem_need * 5 // 4 + (2 << 20), 32 << 20), 64 << 20))

    flops = (2 * N * S_pad * d_pad * 3 * hd_pad                # fused QKV projection (once)
             + 4 * N * n_heads * S_pad * S_pad * head_dim      # QK^T + P.V
             + 2 * N * S_pad * hd_pad * d_pad)                 # output projection
    transcendentals = N * n_heads * S_pad * S_pad + N * n_q * n_kv * TQ * n_heads
    bytes_accessed = (2 * xp.size * itm
                      + (wqkv_t.size + wfc_t.size) * itm
                      + N * S_pad * d_pad * out_itm)

    out_p = pl.pallas_call(
        kernel,
        out_shape=jax.ShapeDtypeStruct((N, S_pad, d_pad), x.dtype),
        grid_spec=pltpu.PrefetchScalarGridSpec(
            num_scalar_prefetch=0,
            grid=(N, n_q, n_kv),
            in_specs=[
                # Query rows of x: one tile per (b, qi), constant across ki.
                pl.BlockSpec((1, TQ, d_pad), lambda b, qi, ki: (b, qi, 0)),
                # Key/value rows of x: streamed only while qi == 0 (K/V cache is filled then);
                # for qi > 0 the index collapses to block 0 so the pipeline stops re-fetching.
                pl.BlockSpec((1, TK, d_pad),
                             lambda b, qi, ki: (b, jnp.where(qi == 0, ki, 0), 0)),
                # Fused Wqkv^T / Wfc^T: whole-array VMEM residents (no double-buffering).
                pl.BlockSpec(memory_space=pltpu.MemorySpace.VMEM),
                pl.BlockSpec(memory_space=pltpu.MemorySpace.VMEM),
            ],
            out_specs=pl.BlockSpec((1, TQ, d_pad), lambda b, qi, ki: (b, qi, 0)),
            scratch_shapes=[
                pltpu.VMEM((TQ, hd_pad), mxu_dtype),        # scaled Q tile
                pltpu.VMEM((S_pad, hd_pad), mxu_dtype),     # projected K cache
                pltpu.VMEM((S_pad, hd_pad), mxu_dtype),     # projected V cache
                pltpu.VMEM((TQ, hd_pad), jnp.float32),      # running max m (head-broadcast)
                pltpu.VMEM((TQ, hd_pad), jnp.float32),      # running denom l (head-broadcast)
                pltpu.VMEM((TQ, hd_pad), jnp.float32),      # un-normalized context acc
            ],
        ),
        compiler_params=pltpu.CompilerParams(
            # Batch stays "parallel" (megacore axis on v7x); the q-tile axis must be
            # "arbitrary" because the projected K/V cache is carried across it.
            dimension_semantics=("parallel", "arbitrary", "arbitrary"),
            vmem_limit_bytes=vmem_limit,
        ),
        cost_estimate=pl.CostEstimate(
            flops=int(flops),
            transcendentals=int(transcendentals),
            bytes_accessed=int(bytes_accessed),
        ),
    )(xp, xp, wqkv_t, wfc_t)

    return out_p[:, :S, :d]


def mha_ref(x, wq, wk, wv, wfc, *, n_heads, head_dim):
    # Pure-JAX reference mirroring the PyTorch forward.
    N, S, d = x.shape
    q = x @ wq.T
    k = x @ wk.T
    v = x @ wv.T
    q = q.reshape(N, S, n_heads, head_dim).transpose(0, 2, 1, 3)
    k = k.reshape(N, S, n_heads, head_dim).transpose(0, 2, 1, 3)
    v = v.reshape(N, S, n_heads, head_dim).transpose(0, 2, 1, 3)
    attn = jax.nn.softmax(jnp.einsum('nhqd,nhkd->nhqk', q, k) / (d ** 0.5), axis=-1)
    out = jnp.einsum('nhqk,nhkd->nhqd', attn, v)
    out = out.transpose(0, 2, 1, 3).reshape(N, S, n_heads * head_dim)
    return out @ wfc.T


if __name__ == "__main__":
    # Small shapes consistent with the module's forward: x is (N, S, model_dim).
    N, S = 2, 8
    model_dim, n_heads, head_dim = 32, 4, 8
    HD = n_heads * head_dim

    key = jax.random.PRNGKey(0)
    kx, kq, kk, kv, kf, kx2 = jax.random.split(key, 6)

    x = jax.random.normal(kx, (N, S, model_dim), dtype=jnp.float32)
    # Deterministic synthetic weights (PyTorch Linear layout: (out_features, in_features)).
    wq = jax.random.normal(kq, (HD, model_dim), dtype=jnp.float32) * (1.0 / model_dim ** 0.5)
    wk = jax.random.normal(kk, (HD, model_dim), dtype=jnp.float32) * (1.0 / model_dim ** 0.5)
    wv = jax.random.normal(kv, (HD, model_dim), dtype=jnp.float32) * (1.0 / model_dim ** 0.5)
    wfc = jax.random.normal(kf, (model_dim, HD), dtype=jnp.float32) * (1.0 / HD ** 0.5)

    ref = mha_ref(x, wq, wk, wv, wfc, n_heads=n_heads, head_dim=head_dim)

    # Exact-math path (f32 MXU operands): must match the reference tightly.
    out_f32 = jax.block_until_ready(
        mha_pallas(x, wq, wk, wv, wfc, n_heads=n_heads, head_dim=head_dim,
                   mxu_dtype=jnp.float32))
    assert out_f32.shape == (N, S, model_dim)
    assert jnp.allclose(out_f32, ref, atol=1e-4, rtol=1e-4), "f32 Pallas MHA mismatch"

    # Fast path (bf16 MXU operands, f32 softmax/accumulation).  Also exercises S padding +
    # padded-key masking (S=8 gets padded to the 16-row bf16 sublane tile).
    out_bf16 = jax.block_until_ready(
        mha_pallas(x, wq, wk, wv, wfc, n_heads=n_heads, head_dim=head_dim))
    assert out_bf16.shape == (N, S, model_dim)
    assert jnp.allclose(out_bf16, ref, atol=5e-2, rtol=5e-2), "bf16 Pallas MHA mismatch"

    # Multi-tile path (explicit tiny tiles): exercises the persistent K/V cache across q-tiles,
    # the online softmax across kv-tiles, and padded-key masking on the last kv tile.
    S2 = 20
    x2 = jax.random.normal(kx2, (N, S2, model_dim), dtype=jnp.float32)
    ref2 = mha_ref(x2, wq, wk, wv, wfc, n_heads=n_heads, head_dim=head_dim)
    out2 = jax.block_until_ready(
        mha_pallas(x2, wq, wk, wv, wfc, n_heads=n_heads, head_dim=head_dim,
                   mxu_dtype=jnp.float32, tile=8))
    assert out2.shape == (N, S2, model_dim)
    assert jnp.allclose(out2, ref2, atol=1e-4, rtol=1e-4), "multi-tile Pallas MHA mismatch"

    print("KERNEL_OK")
</pallas_src>

<mosaic_0001>
module attributes {stable_mosaic.version = 11 : i64} {
  func.func @_mha_kernel(%arg0: i32, %arg1: i32, %arg2: i32, %arg3: memref<1x8x128xf32, #tpu.memory_space<vmem>>, %arg4: memref<1x8x128xf32, #tpu.memory_space<vmem>>, %arg5: memref<128x384xf32, #tpu.memory_space<vmem>>, %arg6: memref<128x128xf32, #tpu.memory_space<vmem>>, %arg7: memref<1x8x128xf32, #tpu.memory_space<vmem>>, %arg8: memref<8x128xf32, #tpu.memory_space<vmem>>, %arg9: memref<8x128xf32, #tpu.memory_space<vmem>>, %arg10: memref<8x128xf32, #tpu.memory_space<vmem>>, %arg11: memref<8x128xf32, #tpu.memory_space<vmem>>, %arg12: memref<8x128xf32, #tpu.memory_space<vmem>>, %arg13: memref<8x128xf32, #tpu.memory_space<vmem>>) attributes {dimension_semantics = [#tpu.dimension_semantics<parallel>, #tpu.dimension_semantics<arbitrary>, #tpu.dimension_semantics<arbitrary>], iteration_bounds = array<i64: 2, 1, 1>, scalar_prefetch = 0 : i64, scratch_operands = 6 : i64, tpu.core_type = #tpu.core_type<tc>, window_params = [{transform_indices = @transform_0, window_bounds = array<i64: 1, 8, 128>}, {transform_indices = @transform_1, window_bounds = array<i64: 1, 8, 128>}, {pipeline_mode = #tpu.pipeline_mode<synchronous>, transform_indices = @transform_2, window_bounds = array<i64: 128, 384>}, {pipeline_mode = #tpu.pipeline_mode<synchronous>, transform_indices = @transform_3, window_bounds = array<i64: 128, 128>}, {transform_indices = @transform_4, window_bounds = array<i64: 1, 8, 128>}]} {
    %c8_i32 = arith.constant 8 : i32
    %0 = arith.muli %arg2, %c8_i32 : i32
    %1 = tpu.assume_multiple %0, 8 : i32
    %c0_i32 = arith.constant 0 : i32
    %2 = arith.cmpi eq, %arg1, %c0_i32 : i32
    %3 = arith.extui %2 : i1 to i32
    %c0_i32_0 = arith.constant 0 : i32
    %4 = arith.cmpi ne, %3, %c0_i32_0 : i32
    scf.if %4 {
      %c0_39 = arith.constant 0 : index
      %c0_40 = arith.constant 0 : index
      %c0_41 = arith.constant 0 : index
      %122 = vector.load %arg4[%c0_39, %c0_40, %c0_41] : memref<1x8x128xf32, #tpu.memory_space<vmem>>, vector<1x8x128xf32>
      %123 = vector.shape_cast %122 : vector<1x8x128xf32> to vector<8x128xf32>
      %c0_42 = arith.constant 0 : index
      %c128 = arith.constant 128 : index
      %124 = vector.load %arg5[%c0_42, %c128] : memref<128x384xf32, #tpu.memory_space<vmem>>, vector<128x128xf32>
      %cst_43 = arith.constant dense<0.000000e+00> : vector<8x128xf32>
      %125 = tpu.matmul %123, %124, %cst_43 {dimension_numbers = #tpu.dot_dimension_numbers<[1], [0], [0], [1], [0, 0, 1, 1], [], []>} : vector<8x128xf32>, vector<128x128xf32>, vector<8x128xf32> -> vector<8x128xf32>
      %c0_44 = arith.constant 0 : index
      %c256 = arith.constant 256 : index
      %126 = vector.load %arg5[%c0_44, %c256] : memref<128x384xf32, #tpu.memory_space<vmem>>, vector<128x128xf32>
      %cst_45 = arith.constant dense<0.000000e+00> : vector<8x128xf32>
      %127 = tpu.matmul %123, %126, %cst_45 {dimension_numbers = #tpu.dot_dimension_numbers<[1], [0], [0], [1], [0, 0, 1, 1], [], []>} : vector<8x128xf32>, vector<128x128xf32>, vector<8x128xf32> -> vector<8x128xf32>
      %128 = arith.index_cast %1 : i32 to index
      %c0_46 = arith.constant 0 : index
      %129 = vector.load %arg9[%128, %c0_46] : memref<8x128xf32, #tpu.memory_space<vmem>>, vector<8x128xf32>
      tpu.vector_store %arg9[%128, %c0_46], %125 {strides = array<i32>} : memref<8x128xf32, #tpu.memory_space<vmem>>, vector<8x128xf32>,
      %130 = arith.index_cast %1 : i32 to index
      %c0_47 = arith.constant 0 : index
      %131 = vector.load %arg10[%130, %c0_47] : memref<8x128xf32, #tpu.memory_space<vmem>>, vector<8x128xf32>
      tpu.vector_store %arg10[%130, %c0_47], %127 {strides = array<i32>} : memref<8x128xf32, #tpu.memory_space<vmem>>, vector<8x128xf32>,
    } else {
    }
    %c0_i32_1 = arith.constant 0 : i32
    %5 = arith.cmpi eq, %arg2, %c0_i32_1 : i32
    %6 = arith.extui %5 : i1 to i32
    %c0_i32_2 = arith.constant 0 : i32
    %7 = arith.cmpi ne, %6, %c0_i32_2 : i32
    scf.if %7 {
      %c0_39 = arith.constant 0 : index
      %c0_40 = arith.constant 0 : index
      %c0_41 = arith.constant 0 : index
      %122 = vector.load %arg3[%c0_39, %c0_40, %c0_41] : memref<1x8x128xf32, #tpu.memory_space<vmem>>, vector<1x8x128xf32>
      %123 = vector.shape_cast %122 : vector<1x8x128xf32> to vector<8x128xf32>
      %c0_42 = arith.constant 0 : index
      %c0_43 = arith.constant 0 : index
      %124 = vector.load %arg5[%c0_42, %c0_43] : memref<128x384xf32, #tpu.memory_space<vmem>>, vector<128x128xf32>
      %cst_44 = arith.constant dense<0.000000e+00> : vector<8x128xf32>
      %125 = tpu.matmul %123, %124, %cst_44 {dimension_numbers = #tpu.dot_dimension_numbers<[1], [0], [0], [1], [0, 0, 1, 1], [], []>} : vector<8x128xf32>, vector<128x128xf32>, vector<8x128xf32> -> vector<8x128xf32>
      %cst_45 = arith.constant 0.176776692 : f32
      %126 = vector.broadcast %cst_45 : f32 to vector<8x128xf32>
      %127 = arith.mulf %125, %126 : vector<8x128xf32>
      %c0_46 = arith.constant 0 : index
      %c0_47 = arith.constant 0 : index
      %128 = vector.load %arg8[%c0_46, %c0_47] : memref<8x128xf32, #tpu.memory_space<vmem>>, vector<8x128xf32>
      tpu.vector_store %arg8[%c0_46, %c0_47], %127 {strides = array<i32>} : memref<8x128xf32, #tpu.memory_space<vmem>>, vector<8x128xf32>,
      %cst_48 = arith.constant -1.000000e+30 : f32
      %129 = vector.broadcast %cst_48 : f32 to vector<8x128xf32>
      %c0_49 = arith.constant 0 : index
      %c0_50 = arith.constant 0 : index
      %130 = vector.load %arg11[%c0_49, %c0_50] : memref<8x128xf32, #tpu.memory_space<vmem>>, vector<8x128xf32>
      tpu.vector_store %arg11[%c0_49, %c0_50], %129 {strides = array<i32>} : memref<8x128xf32, #tpu.memory_space<vmem>>, vector<8x128xf32>,
      %cst_51 = arith.constant 0.000000e+00 : f32
      %131 = vector.broadcast %cst_51 : f32 to vector<8x128xf32>
      %c0_52 = arith.constant 0 : index
      %c0_53 = arith.constant 0 : index
      %132 = vector.load %arg12[%c0_52, %c0_53] : memref<8x128xf32, #tpu.memory_space<vmem>>, vector<8x128xf32>
      tpu.vector_store %arg12[%c0_52, %c0_53], %131 {strides = array<i32>} : memref<8x128xf32, #tpu.memory_space<vmem>>, vector<8x128xf32>,
      %cst_54 = arith.constant 0.000000e+00 : f32
      %133 = vector.broadcast %cst_54 : f32 to vector<8x128xf32>
      %c0_55 = arith.constant 0 : index
      %c0_56 = arith.constant 0 : index
      %134 = vector.load %arg13[%c0_55, %c0_56] : memref<8x128xf32, #tpu.memory_space<vmem>>, vector<8x128xf32>
      tpu.vector_store %arg13[%c0_55, %c0_56], %133 {strides = array<i32>} : memref<8x128xf32, #tpu.memory_space<vmem>>, vector<8x128xf32>,
    } else {
    }
    %c0 = arith.constant 0 : index
    %c0_3 = arith.constant 0 : index
    %8 = vector.load %arg8[%c0, %c0_3] : memref<8x128xf32, #tpu.memory_space<vmem>>, vector<8x128xf32>
    %9 = arith.index_cast %1 : i32 to index
    %c0_4 = arith.constant 0 : index
    %10 = vector.load %arg9[%9, %c0_4] : memref<8x128xf32, #tpu.memory_space<vmem>>, vector<8x128xf32>
    %11 = arith.index_cast %1 : i32 to index
    %c0_5 = arith.constant 0 : index
    %12 = vector.load %arg10[%11, %c0_5] : memref<8x128xf32, #tpu.memory_space<vmem>>, vector<8x128xf32>
    %c0_6 = arith.constant 0 : index
    %c0_7 = arith.constant 0 : index
    %13 = vector.load %arg11[%c0_6, %c0_7] : memref<8x128xf32, #tpu.memory_space<vmem>>, vector<8x128xf32>
    %14 = vector.extract_strided_slice %8 {offsets = [0, 0], sizes = [8, 8], strides = [1, 1]} : vector<8x128xf32> to vector<8x8xf32>
    %15 = vector.extract_strided_slice %10 {offsets = [0, 0], sizes = [8, 8], strides = [1, 1]} : vector<8x128xf32> to vector<8x8xf32>
    %cst = arith.constant dense<0.000000e+00> : vector<8x8xf32>
    %16 = tpu.matmul %14, %15, %cst {dimension_numbers = #tpu.dot_dimension_numbers<[1], [1], [0], [0], [0, 0, 1, 0], [], []>} : vector<8x8xf32>, vector<8x8xf32>, vector<8x8xf32> -> vector<8x8xf32>
    %17 = vector.extract_strided_slice %13 {offsets = [0, 0], sizes = [8, 1], strides = [1, 1]} : vector<8x128xf32> to vector<8x1xf32>
    %cst_8 = arith.constant dense<0xFF800000> : vector<8xf32>
    %18 = vector.multi_reduction <maximumf>, %16, %cst_8 [1] : vector<8x8xf32> to vector<8xf32>
    %19 = vector.shape_cast %18 : vector<8xf32> to vector<8x1xf32>
    %20 = arith.maximumf %17, %19 : vector<8x1xf32>
    %21 = arith.subf %17, %20 : vector<8x1xf32>
    %22 = math.exp %21 : vector<8x1xf32>
    %23 = vector.broadcast %20 : vector<8x1xf32> to vector<8x8xf32>
    %24 = arith.subf %16, %23 : vector<8x8xf32>
    %25 = math.exp %24 : vector<8x8xf32>
    %26 = vector.shape_cast %20 : vector<8x1xf32> to vector<8x1xf32>
    %27 = vector.broadcast %26 : vector<8x1xf32> to vector<8x8xf32>
    %28 = vector.shape_cast %22 : vector<8x1xf32> to vector<8x1xf32>
    %29 = vector.broadcast %28 : vector<8x1xf32> to vector<8x8xf32>
    %cst_9 = arith.constant dense<0.000000e+00> : vector<8xf32>
    %30 = vector.multi_reduction <add>, %25, %cst_9 [1] : vector<8x8xf32> to vector<8xf32>
    %31 = vector.shape_cast %30 : vector<8xf32> to vector<8x1xf32>
    %32 = vector.shape_cast %31 : vector<8x1xf32> to vector<8x1xf32>
    %33 = vector.broadcast %32 : vector<8x1xf32> to vector<8x8xf32>
    %34 = vector.extract_strided_slice %12 {offsets = [0, 0], sizes = [8, 8], strides = [1, 1]} : vector<8x128xf32> to vector<8x8xf32>
    %cst_10 = arith.constant dense<0.000000e+00> : vector<8x8xf32>
    %35 = tpu.matmul %25, %34, %cst_10 {dimension_numbers = #tpu.dot_dimension_numbers<[1], [0], [0], [1], [0, 0, 1, 1], [], []>} : vector<8x8xf32>, vector<8x8xf32>, vector<8x8xf32> -> vector<8x8xf32>
    %36 = vector.extract_strided_slice %8 {offsets = [0, 8], sizes = [8, 8], strides = [1, 1]} : vector<8x128xf32> to vector<8x8xf32>
    %37 = vector.extract_strided_slice %10 {offsets = [0, 8], sizes = [8, 8], strides = [1, 1]} : vector<8x128xf32> to vector<8x8xf32>
    %cst_11 = arith.constant dense<0.000000e+00> : vector<8x8xf32>
    %38 = tpu.matmul %36, %37, %cst_11 {dimension_numbers = #tpu.dot_dimension_numbers<[1], [1], [0], [0], [0, 0, 1, 0], [], []>} : vector<8x8xf32>, vector<8x8xf32>, vector<8x8xf32> -> vector<8x8xf32>
    %39 = vector.extract_strided_slice %13 {offsets = [0, 8], sizes = [8, 1], strides = [1, 1]} : vector<8x128xf32> to vector<8x1xf32>
    %cst_12 = arith.constant dense<0xFF800000> : vector<8xf32>
    %40 = vector.multi_reduction <maximumf>, %38, %cst_12 [1] : vector<8x8xf32> to vector<8xf32>
    %41 = vector.shape_cast %40 : vector<8xf32> to vector<8x1xf32>
    %42 = arith.maximumf %39, %41 : vector<8x1xf32>
    %43 = arith.subf %39, %42 : vector<8x1xf32>
    %44 = math.exp %43 : vector<8x1xf32>
    %45 = vector.broadcast %42 : vector<8x1xf32> to vector<8x8xf32>
    %46 = arith.subf %38, %45 : vector<8x8xf32>
    %47 = math.exp %46 : vector<8x8xf32>
    %48 = vector.shape_cast %42 : vector<8x1xf32> to vector<8x1xf32>
    %49 = vector.broadcast %48 : vector<8x1xf32> to vector<8x8xf32>
    %50 = vector.shape_cast %44 : vector<8x1xf32> to vector<8x1xf32>
    %51 = vector.broadcast %50 : vector<8x1xf32> to vector<8x8xf32>
    %cst_13 = arith.constant dense<0.000000e+00> : vector<8xf32>
    %52 = vector.multi_reduction <add>, %47, %cst_13 [1] : vector<8x8xf32> to vector<8xf32>
    %53 = vector.shape_cast %52 : vector<8xf32> to vector<8x1xf32>
    %54 = vector.shape_cast %53 : vector<8x1xf32> to vector<8x1xf32>
    %55 = vector.broadcast %54 : vector<8x1xf32> to vector<8x8xf32>
    %56 = vector.extract_strided_slice %12 {offsets = [0, 8], sizes = [8, 8], strides = [1, 1]} : vector<8x128xf32> to vector<8x8xf32>
    %cst_14 = arith.constant dense<0.000000e+00> : vector<8x8xf32>
    %57 = tpu.matmul %47, %56, %cst_14 {dimension_numbers = #tpu.dot_dimension_numbers<[1], [0], [0], [1], [0, 0, 1, 1], [], []>} : vector<8x8xf32>, vector<8x8xf32>, vector<8x8xf32> -> vector<8x8xf32>
    %58 = vector.extract_strided_slice %8 {offsets = [0, 16], sizes = [8, 8], strides = [1, 1]} : vector<8x128xf32> to vector<8x8xf32>
    %59 = vector.extract_strided_slice %10 {offsets = [0, 16], sizes = [8, 8], strides = [1, 1]} : vector<8x128xf32> to vector<8x8xf32>
    %cst_15 = arith.constant dense<0.000000e+00> : vector<8x8xf32>
    %60 = tpu.matmul %58, %59, %cst_15 {dimension_numbers = #tpu.dot_dimension_numbers<[1], [1], [0], [0], [0, 0, 1, 0], [], []>} : vector<8x8xf32>, vector<8x8xf32>, vector<8x8xf32> -> vector<8x8xf32>
    %61 = vector.extract_strided_slice %13 {offsets = [0, 16], sizes = [8, 1], strides = [1, 1]} : vector<8x128xf32> to vector<8x1xf32>
    %cst_16 = arith.constant dense<0xFF800000> : vector<8xf32>
    %62 = vector.multi_reduction <maximumf>, %60, %cst_16 [1] : vector<8x8xf32> to vector<8xf32>
    %63 = vector.shape_cast %62 : vector<8xf32> to vector<8x1xf32>
    %64 = arith.maximumf %61, %63 : vector<8x1xf32>
    %65 = arith.subf %61, %64 : vector<8x1xf32>
    %66 = math.exp %65 : vector<8x1xf32>
    %67 = vector.broadcast %64 : vector<8x1xf32> to vector<8x8xf32>
    %68 = arith.subf %60, %67 : vector<8x8xf32>
    %69 = math.exp %68 : vector<8x8xf32>
    %70 = vector.shape_cast %64 : vector<8x1xf32> to vector<8x1xf32>
    %71 = vector.broadcast %70 : vector<8x1xf32> to vector<8x8xf32>
    %72 = vector.shape_cast %66 : vector<8x1xf32> to vector<8x1xf32>
    %73 = vector.broadcast %72 : vector<8x1xf32> to vector<8x8xf32>
    %cst_17 = arith.constant dense<0.000000e+00> : vector<8xf32>
    %74 = vector.multi_reduction <add>, %69, %cst_17 [1] : vector<8x8xf32> to vector<8xf32>
    %75 = vector.shape_cast %74 : vector<8xf32> to vector<8x1xf32>
    %76 = vector.shape_cast %75 : vector<8x1xf32> to vector<8x1xf32>
    %77 = vector.broadcast %76 : vector<8x1xf32> to vector<8x8xf32>
    %78 = vector.extract_strided_slice %12 {offsets = [0, 16], sizes = [8, 8], strides = [1, 1]} : vector<8x128xf32> to vector<8x8xf32>
    %cst_18 = arith.constant dense<0.000000e+00> : vector<8x8xf32>
    %79 = tpu.matmul %69, %78, %cst_18 {dimension_numbers = #tpu.dot_dimension_numbers<[1], [0], [0], [1], [0, 0, 1, 1], [], []>} : vector<8x8xf32>, vector<8x8xf32>, vector<8x8xf32> -> vector<8x8xf32>
    %80 = vector.extract_strided_slice %8 {offsets = [0, 24], sizes = [8, 8], strides = [1, 1]} : vector<8x128xf32> to vector<8x8xf32>
    %81 = vector.extract_strided_slice %10 {offsets = [0, 24], sizes = [8, 8], strides = [1, 1]} : vector<8x128xf32> to vector<8x8xf32>
    %cst_19 = arith.constant dense<0.000000e+00> : vector<8x8xf32>
    %82 = tpu.matmul %80, %81, %cst_19 {dimension_numbers = #tpu.dot_dimension_numbers<[1], [1], [0], [0], [0, 0, 1, 0], [], []>} : vector<8x8xf32>, vector<8x8xf32>, vector<8x8xf32> -> vector<8x8xf32>
    %83 = vector.extract_strided_slice %13 {offsets = [0, 24], sizes = [8, 1], strides = [1, 1]} : vector<8x128xf32> to vector<8x1xf32>
    %cst_20 = arith.constant dense<0xFF800000> : vector<8xf32>
    %84 = vector.multi_reduction <maximumf>, %82, %cst_20 [1] : vector<8x8xf32> to vector<8xf32>
    %85 = vector.shape_cast %84 : vector<8xf32> to vector<8x1xf32>
    %86 = arith.maximumf %83, %85 : vector<8x1xf32>
    %87 = arith.subf %83, %86 : vector<8x1xf32>
    %88 = math.exp %87 : vector<8x1xf32>
    %89 = vector.broadcast %86 : vector<8x1xf32> to vector<8x8xf32>
    %90 = arith.subf %82, %89 : vector<8x8xf32>
    %91 = math.exp %90 : vector<8x8xf32>
    %92 = vector.shape_cast %86 : vector<8x1xf32> to vector<8x1xf32>
    %93 = vector.broadcast %92 : vector<8x1xf32> to vector<8x8xf32>
    %94 = vector.shape_cast %88 : vector<8x1xf32> to vector<8x1xf32>
    %95 = vector.broadcast %94 : vector<8x1xf32> to vector<8x8xf32>
    %cst_21 = arith.constant dense<0.000000e+00> : vector<8xf32>
    %96 = vector.multi_reduction <add>, %91, %cst_21 [1] : vector<8x8xf32> to vector<8xf32>
    %97 = vector.shape_cast %96 : vector<8xf32> to vector<8x1xf32>
    %98 = vector.shape_cast %97 : vector<8x1xf32> to vector<8x1xf32>
    %99 = vector.broadcast %98 : vector<8x1xf32> to vector<8x8xf32>
    %100 = vector.extract_strided_slice %12 {offsets = [0, 24], sizes = [8, 8], strides = [1, 1]} : vector<8x128xf32> to vector<8x8xf32>
    %cst_22 = arith.constant dense<0.000000e+00> : vector<8x8xf32>
    %101 = tpu.matmul %91, %100, %cst_22 {dimension_numbers = #tpu.dot_dimension_numbers<[1], [0], [0], [1], [0, 0, 1, 1], [], []>} : vector<8x8xf32>, vector<8x8xf32>, vector<8x8xf32> -> vector<8x8xf32>
    %cst_23 = arith.constant 0.000000e+00 : f32
    %102 = vector.broadcast %cst_23 : f32 to vector<8x96xf32>
    %cst_24 = arith.constant 0.000000e+00 : f32
    %103 = vector.broadcast %cst_24 : f32 to vector<8x96xf32>
    %cst_25 = arith.constant 1.000000e+00 : f32
    %104 = vector.broadcast %cst_25 : f32 to vector<8x96xf32>
    %cst_26 = arith.constant 0.000000e+00 : f32
    %105 = vector.broadcast %cst_26 : f32 to vector<8x96xf32>
    %106 = tpu.concatenate %27, %49, %71, %93, %102 in 1 : vector<8x8xf32>, vector<8x8xf32>, vector<8x8xf32>, vector<8x8xf32>, vector<8x96xf32> -> vector<8x128xf32>
    %107 = tpu.concatenate %29, %51, %73, %95, %103 in 1 : vector<8x8xf32>, vector<8x8xf32>, vector<8x8xf32>, vector<8x8xf32>, vector<8x96xf32> -> vector<8x128xf32>
    %108 = tpu.concatenate %33, %55, %77, %99, %104 in 1 : vector<8x8xf32>, vector<8x8xf32>, vector<8x8xf32>, vector<8x8xf32>, vector<8x96xf32> -> vector<8x128xf32>
    %109 = tpu.concatenate %35, %57, %79, %101, %105 in 1 : vector<8x8xf32>, vector<8x8xf32>, vector<8x8xf32>, vector<8x8xf32>, vector<8x96xf32> -> vector<8x128xf32>
    %c0_27 = arith.constant 0 : index
    %c0_28 = arith.constant 0 : index
    %110 = vector.load %arg12[%c0_27, %c0_28] : memref<8x128xf32, #tpu.memory_space<vmem>>, vector<8x128xf32>
    %111 = arith.mulf %107, %110 : vector<8x128xf32>
    %112 = arith.addf %111, %108 : vector<8x128xf32>
    %c0_29 = arith.constant 0 : index
    %c0_30 = arith.constant 0 : index
    %113 = vector.load %arg12[%c0_29, %c0_30] : memref<8x128xf32, #tpu.memory_space<vmem>>, vector<8x128xf32>
    tpu.vector_store %arg12[%c0_29, %c0_30], %112 {strides = array<i32>} : memref<8x128xf32, #tpu.memory_space<vmem>>, vector<8x128xf32>,
    %c0_31 = arith.constant 0 : index
    %c0_32 = arith.constant 0 : index
    %114 = vector.load %arg13[%c0_31, %c0_32] : memref<8x128xf32, #tpu.memory_space<vmem>>, vector<8x128xf32>
    %115 = arith.mulf %107, %114 : vector<8x128xf32>
    %116 = arith.addf %115, %109 : vector<8x128xf32>
    %c0_33 = arith.constant 0 : index
    %c0_34 = arith.constant 0 : index
    %117 = vector.load %arg13[%c0_33, %c0_34] : memref<8x128xf32, #tpu.memory_space<vmem>>, vector<8x128xf32>
    tpu.vector_store %arg13[%c0_33, %c0_34], %116 {strides = array<i32>} : memref<8x128xf32, #tpu.memory_space<vmem>>, vector<8x128xf32>,
    %c0_35 = arith.constant 0 : index
    %c0_36 = arith.constant 0 : index
    %118 = vector.load %arg11[%c0_35, %c0_36] : memref<8x128xf32, #tpu.memory_space<vmem>>, vector<8x128xf32>
    tpu.vector_store %arg11[%c0_35, %c0_36], %106 {strides = array<i32>} : memref<8x128xf32, #tpu.memory_space<vmem>>, vector<8x128xf32>,
    %c0_i32_37 = arith.constant 0 : i32
    %119 = arith.cmpi eq, %arg2, %c0_i32_37 : i32
    %120 = arith.extui %119 : i1 to i32
    %c0_i32_38 = arith.constant 0 : i32
    %121 = arith.cmpi ne, %120, %c0_i32_38 : i32
    scf.if %121 {
      %c0_39 = arith.constant 0 : index
      %c0_40 = arith.constant 0 : index
      %122 = vector.load %arg12[%c0_39, %c0_40] : memref<8x128xf32, #tpu.memory_space<vmem>>, vector<8x128xf32>
      %123 = tpu.reciprocal %122 {approx = true} : vector<8x128xf32> -> vector<8x128xf32>
      %124 = arith.mulf %122, %123 : vector<8x128xf32>
      %cst_41 = arith.constant 2.000000e+00 : f32
      %125 = vector.broadcast %cst_41 : f32 to vector<8x128xf32>
      %126 = arith.subf %125, %124 : vector<8x128xf32>
      %127 = arith.mulf %123, %126 : vector<8x128xf32>
      %c0_42 = arith.constant 0 : index
      %c0_43 = arith.constant 0 : index
      %128 = vector.load %arg13[%c0_42, %c0_43] : memref<8x128xf32, #tpu.memory_space<vmem>>, vector<8x128xf32>
      %129 = arith.mulf %128, %127 : vector<8x128xf32>
      %c0_44 = arith.constant 0 : index
      %c0_45 = arith.constant 0 : index
      %130 = vector.load %arg6[%c0_44, %c0_45] : memref<128x128xf32, #tpu.memory_space<vmem>>, vector<128x128xf32>
      %cst_46 = arith.constant dense<0.000000e+00> : vector<8x128xf32>
      %131 = tpu.matmul %129, %130, %cst_46 {dimension_numbers = #tpu.dot_dimension_numbers<[1], [0], [0], [1], [0, 0, 1, 1], [], []>} : vector<8x128xf32>, vector<128x128xf32>, vector<8x128xf32> -> vector<8x128xf32>
      %c0_47 = arith.constant 0 : index
      %c0_48 = arith.constant 0 : index
      %c0_49 = arith.constant 0 : index
      %132 = vector.load %arg7[%c0_47, %c0_48, %c0_49] : memref<1x8x128xf32, #tpu.memory_space<vmem>>, vector<1x8x128xf32>
      %133 = vector.shape_cast %132 : vector<1x8x128xf32> to vector<8x128xf32>
      %134 = vector.shape_cast %131 : vector<8x128xf32> to vector<1x8x128xf32>
      tpu.vector_store %arg7[%c0_47, %c0_48, %c0_49], %134 {strides = array<i32>} : memref<1x8x128xf32, #tpu.memory_space<vmem>>, vector<1x8x128xf32>,
    } else {
    }
    return
  }
  func.func @transform_0(%arg0: i32, %arg1: i32, %arg2: i32) -> (i32, i32, i32) {
    %c0_i32 = arith.constant 0 : i32
    %c0_i32_0 = arith.constant 0 : i32
    return %arg0, %arg1, %c0_i32 : i32, i32, i32
  }
  func.func @transform_1(%arg0: i32, %arg1: i32, %arg2: i32) -> (i32, i32, i32) {
    %c0_i32 = arith.constant 0 : i32
    %0 = arith.cmpi eq, %arg1, %c0_i32 : i32
    %c0_i32_0 = arith.constant 0 : i32
    %1 = arith.select %0, %arg2, %c0_i32_0 : i32
    %c0_i32_1 = arith.constant 0 : i32
    %c0_i32_2 = arith.constant 0 : i32
    return %arg0, %1, %c0_i32_1 : i32, i32, i32
  }
  func.func @transform_2(%arg0: i32, %arg1: i32, %arg2: i32) -> (i32, i32) {
    %c0_i32 = arith.constant 0 : i32
    %c0_i32_0 = arith.constant 0 : i32
    %c0_i32_1 = arith.constant 0 : i32
    return %c0_i32, %c0_i32_0 : i32, i32
  }
  func.func @transform_3(%arg0: i32, %arg1: i32, %arg2: i32) -> (i32, i32) {
    %c0_i32 = arith.constant 0 : i32
    %c0_i32_0 = arith.constant 0 : i32
    %c0_i32_1 = arith.constant 0 : i32
    return %c0_i32, %c0_i32_0 : i32, i32
  }
  func.func @transform_4(%arg0: i32, %arg1: i32, %arg2: i32) -> (i32, i32, i32) {
    %c0_i32 = arith.constant 0 : i32
    %c0_i32_0 = arith.constant 0 : i32
    return %arg0, %arg1, %c0_i32 : i32, i32, i32
  }
}

</mosaic_0001>

<bundles_post_ra>
// kernel: tpu_custom_call.1
= control target key start
LH: loop header
LB: loop body
LE: loop exit
PB: predicated region body
PF: predicated region fallthrough
CT: control target
= control target key end

     0   :  { %s2802_s0 = inlined_call_operand.hbm [shape: f32[2,8,128], index: 0, kind: input, shape index: {}]   ;;  %s2803_s1 = inlined_call_operand.hbm [shape: f32[2,8,128], index: 1, kind: input, shape index: {}]   ;;  %s2804_s2 = inlined_call_operand.hbm [shape: f32[128,384], index: 2, kind: input, shape index: {}]   ;;  %s2805_s3 = inlined_call_operand.hbm [shape: f32[128,128], index: 3, kind: input, shape index: {}]   ;;  %s2806_s4 = inlined_call_operand.hbm [shape: f32[2,8,128], index: 4, kind: output, shape index: {}]  }
   0x1   :  { %2812 = sst [smem:[#allocation23_spill]] %s2804_s2 }
   0x2   :  { %2813 = sst [smem:[#allocation24_spill]] %s2805_s3 }
   0x3   :  { %9 = vsyncpa [#allocation9], 0 }
   0x4   :  { %11 = vsyncpa [#allocation9 + $0x1], 0 }
   0x5   :  { %12 = vsyncpa [#allocation12], 0 }
   0x6   :  { %14 = vsyncpa [#allocation12 + $0x1], 0 }
   0x7   :  { %15 = vsyncpa [#allocation15], 0 }
   0x8   :  { %16 = vsyncpa [#allocation10], 0 }
   0x9   :  { %18 = vsyncpa [#allocation10 + $0x1], 0  ;;  %s2372_s15 = smov 0   ;;  %s2374_s16 = smov 0  }
   0xa   :  { %s2376_s17 = smov 0   ;;  %s2378_s18 = smov 0  }
   0xb   :  { %s2380_s19 = smov 0   ;;  %s2382_s20 = smov 0  }
   0xc LB: > { %s2403_s21 = sadd.s32 4294967295, %s2323_s20   ;;  %s1590_s22 = sadd.s32 4294967294, %s2323_s20   ;;  %s2323_s20 = sphi %s2382_s20, %s24_s20   ;;  %s2319_s19 = sphi %s2380_s19, %s2838_s19   ;;  %s2315_s18 = sphi %s2378_s18, %s2837_s18   ;;  %s2311_s17 = sphi %s2376_s17, %s2836_s17   ;;  %s2307_s16 = sphi %s2374_s16, %s2835_s16   ;;  %s2303_s15 = sphi %s2372_s15, %s2834_s15  }
   0xd   : > { %p65_p0 = scmp.ne.s32.totalorder %s2307_s16, %s2303_s15  ;;  %p2807_p1 = scmp.eq.s32.totalorder %s2403_s21, 0 }
   0xe   : > { %p171_p3 = scmp.eq.s32.totalorder %s1590_s22, 1  ;;  %p1591_p5 = scmp.ge.s32.totalorder %s2323_s20, 1 }
   0xf   : > { %p2412_p4 = por %p2807_p1, %p65_p0  ;;  %p178_p7 = scmp.lt.s32.totalorder %s2323_s20, 3 }
  0x10   : > { %p2417_p6 = por %p171_p3, %p65_p0  ;;  %s2325_s26 = smov [#allocation13]  }
  0x11   : > { %s2814_s23 = scalar_select %p2412_p4, 1, 0 }
  0x12   : > { %s2815_s24 = scalar_select %p2417_p6, 1, 0 }
  0x13   : > { %p2422_p8 = pnand %p1591_p5, %p178_p7  ;;  %s190_s27 = sshll.u32 %s2325_s26, 4  ;;  %s2426_s27 = int_to_ptr.vmem [resolvable:$true] %s190_s27 }
  0x14   : > { %s2326_s29 = smov [#allocation14]   ;;  %s2818_s2 = sld [smem:[#allocation23_spill]] }
  0x15   : > { %s2816_s25 = scalar_select %p2422_p8, 1, 0 }
  0x16   : > { %p1995_p9 = pneg %p2422_p8  ;;  %s203_s30 = sshll.u32 %s2326_s29, 4  ;;  %s2437_s30 = int_to_ptr.vmem [resolvable:$true] %s203_s30 }
  0x18   : > { %p2433_p11 = pnand %p1995_p9, %p2807_p1 }
  0x1a   : > { %s2113_s7 = scalar_lea.hbm %s2818_s2, 6144  ;;  %p2115_p13 = pneg %p2433_p11 }
  0x1b   : > { %p2114_p12 = scmp.ne.s32.totalorder %s2818_s2, %s2113_s7  ;;  %p2120_p5 = scmp.lt.u32.totalorder %s2113_s7, %s2818_s2 }
  0x1d   : > { %p2116_p0 = pnand %p2115_p13, %p2114_p12 }
  0x1f   : > { %p2117_p3 = pneg %p2116_p0 }
  0x21   : > { %p2122_p7 = pnand %p2120_p5, %p2117_p3 }
  0x23   : > { %2125 = shalt.err (!%p2122_p7)
}
  0x24   : > { %s2126_s12 = scalar_lea.vmem %s2426_s27, 6144  ;;  %p2134_p2 = scmp.lt.s32.totalorder %s2426_s27, %s2426_s27 }
  0x25   : > { %p2127_p9 = scmp.ne.s32.totalorder %s2426_s27, %s2126_s12  ;;  %p2135_p12 = scmp.lt.s32.totalorder %s2126_s12, %s2126_s12 }
  0x27   : > { %p2129_p10 = pnand %p2127_p9, %p2115_p13  ;;  %p2136_p0 = por %p2135_p12, %p2134_p2 }
  0x29   : > { %p2130_p1 = pneg %p2129_p10 }
  0x2b   : > { %p2137_p6 = pnand %p2136_p0, %p2130_p1 }
  0x2d   : > { %2140 = shalt.err (!%p2137_p6)
}
  0x2e   : > { %s2327_s13 = smov 384   ;;  %s2328_s14 = smov 24  }
  0x2f   : > { %1998 = dma.hbm_to_vmem [thread:$0]  (!%p2433_p11), %s2818_s2, 6144, %s2426_s27, [#allocation12], %s2327_s13, %s2327_s13, %s2328_s14  }
  0x30   : > { %s2819_s3 = sld [smem:[#allocation24_spill]] }
  0x36   : > { %s2141_s6 = scalar_lea.hbm %s2819_s3, 2048 }
  0x37   : > { %p2142_p2 = scmp.ne.s32.totalorder %s2819_s3, %s2141_s6  ;;  %p2148_p10 = scmp.lt.u32.totalorder %s2141_s6, %s2819_s3 }
  0x39   : > { %p2144_p1 = pnand %p2142_p2, %p2115_p13 }
  0x3b   : > { %p2145_p6 = pneg %p2144_p1 }
  0x3d   : > { %p2150_p3 = pnand %p2148_p10, %p2145_p6 }
  0x3f   : > { %2153 = shalt.err (!%p2150_p3)
}
  0x40   : > { %s2154_s27 = scalar_lea.vmem %s2437_s30, 2048  ;;  %p2162_p12 = scmp.lt.s32.totalorder %s2437_s30, %s2437_s30 }
  0x41   : > { %p2155_p5 = scmp.ne.s32.totalorder %s2437_s30, %s2154_s27  ;;  %p2163_p0 = scmp.lt.s32.totalorder %s2154_s27, %s2154_s27 }
  0x43   : > { %p2157_p7 = pnand %p2155_p5, %p2115_p13  ;;  %p2164_p2 = por %p2163_p0, %p2162_p12 }
  0x45   : > { %p2158_p9 = pneg %p2157_p7 }
  0x47   : > { %p2165_p1 = pnand %p2164_p2, %p2158_p9 }
  0x49   : > { %2168 = shalt.err (!%p2165_p1)
}
  0x4a   : > { %s2329_s11 = smov 128   ;;  %s2330_s12 = smov 8  }
  0x4b   : > { %2001 = dma.hbm_to_vmem [thread:$0]  (!%p2433_p11), %s2819_s3, 2048, %s2437_s30, [#allocation15], %s2329_s11, %s2329_s11, %s2330_s12  }
  0x4c   : > { %s43_s22 = sadd.s32 1, %s2319_s19  ;;  %s52_s26 = sadd.s32 1, %s2311_s17 }
  0x4d   : > { %p45_p13 = scmp.ge.s32.totalorder %s43_s22, 2  ;;  %p59_p6 = scmp.ne.s32.totalorder %s2311_s17, %s2307_s16 }
  0x4e   : > { %p60_p10 = scmp.eq.s32.totalorder %s2323_s20, 0  ;;  %p2015_p3 = scmp.lt.s32.totalorder %s2323_s20, 2 }
  0x4f   : > { %s2840_s22 = smov (%p45_p13, %s43_s22), 0  ;;  %p2821_p7 = scmp.eq.s32.totalorder %s2403_s21, 1 }
  0x50   : > { %2820 = sst [smem:[#allocation22_spill]] %s2840_s22  ;;  %p61_p5 = por %p60_p10, %p59_p6 }
  0x51   : > { %p2501_p9 = por %p2821_p7, %p59_p6  ;;  %s47_s28 = ssub.s32 %s2319_s19, %s2840_s22 }
  0x52   : > { %s217_s5 = sand.u32 1, %s2311_s17   ;;  %p50_p12 = scmp.eq.s32.totalorder %s47_s28, 0 }
  0x53   : > { %s2822_s29 = scalar_select %p2501_p9, 1, 0 }
  0x54   : > { %s2508_s30 = sshll.u32 %s217_s5, 3  ;;  %s1596_s6 = sshll.u32 %s2319_s19, 7 }
  0x55   : > { %s2512_s7 = scalar_select %p50_p12, %s2311_s17, %s52_s26  }
  0x56   : > { %s2517_s10 = scalar_lea.hbm %s2802_s0, %s1596_s6  ;;  %s221_s27 = scalar_lea.vmem [#allocation8], %s2508_s30 }
  0x57   : > { %s229_s11 = sshll.u32 %s221_s27, 4  ;;  %p2522_p11 = pnand %p2015_p3, %p61_p5  ;;  %s2526_s11 = int_to_ptr.vmem [resolvable:$true] %s229_s11 }
  0x58   : > { %s2531_s26 = scalar_lea.hbm %s2803_s1, %s1596_s6  ;;  %s218_s28 = scalar_lea.sflag [#allocation9], %s217_s5 }
  0x59   : > { %s2169_s8 = scalar_lea.hbm %s2517_s10, 128  ;;  %p2171_p2 = pneg %p2522_p11 }
  0x5a   : > { %p2170_p0 = scmp.ne.s32.totalorder %s2517_s10, %s2169_s8  ;;  %s2174_s2 = scalar_lea.hbm %s2802_s0, 256 }
  0x5b   : > { %p2175_p6 = scmp.lt.u32.totalorder %s2517_s10, %s2802_s0  ;;  %p2176_p10 = scmp.lt.u32.totalorder %s2174_s2, %s2169_s8 }
  0x5c   : > { %p2172_p1 = pnand %p2171_p2, %p2170_p0  ;;  %p2178_p5 = scmp.lt.u32.totalorder %s2169_s8, %s2517_s10 }
  0x5d   : > { %p2177_p3 = por %p2176_p10, %p2175_p6 }
  0x5e   : > { %p2173_p13 = pneg %p2172_p1 }
  0x5f   : > { %p2179_p7 = por %p2178_p5, %p2177_p3 }
  0x61   : > { %p2180_p12 = pnand %p2179_p7, %p2173_p13 }
  0x63   : > { %2183 = shalt.err (!%p2180_p12)
}
  0x64   : > { %s2184_s5 = scalar_lea.vmem %s2526_s11, 128  ;;  %s2331_s6 = smov [#allocation8]  }
  0x65   : > { %p2185_p0 = scmp.ne.s32.totalorder %s2526_s11, %s2184_s5  ;;  %s2189_s13 = sshll.u32 %s2331_s6, 4  ;;  %s2190_s13 = int_to_ptr.vmem [resolvable:$false] %s2189_s13 }
  0x66   : > { %s2191_s3 = scalar_lea.vmem %s2190_s13, 256  ;;  %p2192_p4 = scmp.lt.s32.totalorder %s2526_s11, %s2190_s13 }
  0x67   : > { %p2187_p1 = pnand %p2185_p0, %p2171_p2  ;;  %p2193_p6 = scmp.lt.s32.totalorder %s2191_s3, %s2184_s5 }
  0x69   : > { %p2188_p9 = pneg %p2187_p1  ;;  %p2194_p10 = por %p2193_p6, %p2192_p4 }
  0x6b   : > { %p2195_p3 = pnand %p2194_p10, %p2188_p9 }
  0x6d   : > { %2198 = shalt.err (!%p2195_p3)
}
  0x6e   : > { %2005 = dma.hbm_to_vmem [thread:$0]  (!%p2522_p11), %s2517_s10, 128, %s2526_s11, %s218_s28  }
  0x6f   : > { %s236_s2 = sand.u32 1, %s2323_s20   ;;  %s240_s22 = scalar_lea.vmem [#allocation11], %s2508_s30 }
  0x70   : > { %s250_s14 = sshll.u32 %s240_s22, 4  ;;  %s237_s8 = scalar_lea.sflag [#allocation12], %s236_s2  ;;  %s251_s14 = int_to_ptr.vmem [resolvable:$true] %s250_s14 }
  0x71   : > { %s2199_s9 = scalar_lea.hbm %s2531_s26, 128  ;;  %s2204_s6 = scalar_lea.hbm %s2803_s1, 256 }
  0x72   : > { %p2200_p4 = scmp.ne.s32.totalorder %s2531_s26, %s2199_s9  ;;  %p2205_p5 = scmp.lt.u32.totalorder %s2531_s26, %s2803_s1 }
  0x73   : > { %p2206_p7 = scmp.lt.u32.totalorder %s2204_s6, %s2199_s9  ;;  %p2208_p0 = scmp.lt.u32.totalorder %s2199_s9, %s2531_s26 }
  0x74   : > { %p2202_p9 = pnand %p2200_p4, %p2171_p2 }
  0x75   : > { %p2207_p12 = por %p2206_p7, %p2205_p5 }
  0x76   : > { %p2203_p13 = pneg %p2202_p9 }
  0x77   : > { %p2209_p1 = por %p2208_p0, %p2207_p12 }
  0x79   : > { %p2210_p6 = pnand %p2209_p1, %p2203_p13 }
  0x7b   : > { %2213 = shalt.err (!%p2210_p6)
}
  0x7c   : > { %s2214_s30 = scalar_lea.vmem %s251_s14, 128  ;;  %s2332_s10 = smov [#allocation11]  }
  0x7d   : > { %p2215_p10 = scmp.ne.s32.totalorder %s251_s14, %s2214_s30  ;;  %s2219_s11 = sshll.u32 %s2332_s10, 4  ;;  %s2220_s11 = int_to_ptr.vmem [resolvable:$false] %s2219_s11 }
  0x7e   : > { %s2221_s28 = scalar_lea.vmem %s2220_s11, 256  ;;  %p2222_p9 = scmp.lt.s32.totalorder %s251_s14, %s2220_s11 }
  0x7f   : > { %p2217_p3 = pnand %p2215_p10, %p2171_p2  ;;  %p2223_p8 = scmp.lt.s32.totalorder %s2221_s28, %s2214_s30 }
  0x81   : > { %p2218_p4 = pneg %p2217_p3  ;;  %p2224_p5 = por %p2223_p8, %p2222_p9 }
  0x83   : > { %p2225_p7 = pnand %p2224_p5, %p2218_p4 }
  0x85   : > { %2228 = shalt.err (!%p2225_p7)
}
  0x86   : > { %2008 = dma.hbm_to_vmem [thread:$0]  (!%p2522_p11), %s2531_s26, 128, %s251_s14, %s237_s8  }
  0x87   : > { %p2824_p13 = scmp.ne.s32.totalorder %s2816_s25, 0 }
  0x88   : > { %s2582_s2 = sand.u32 (!%p2824_p13), 1, %s2307_s16   ;;  %p2825_p8 = scmp.ne.s32.totalorder (!%p2824_p13), %s2814_s23, 0 }
  0x89   : > { %259 = sbr.rel (%p2824_p13) target bundleno = 3007 (0xbbf), region = 36  ;;  %s2585_s22 = sshll.u32 (!%p2824_p13), %s2582_s2, 3 }
  0x8a   : > { %s262_s9 = scalar_lea.sflag (!%p2824_p13), [#allocation9], %s2582_s2  ;;  %s265_s27 = scalar_lea.vmem (!%p2824_p13), [#allocation8], %s2585_s22 }
  0x90   : > { %2282 = dma.done.wait (%p2825_p8), %s262_s9, 128  }
  0x91   : > { %2284 = vsyncadd (%p2825_p8), %s262_s9, 4294967168  ;;  %s270_s25 = sand.u32 1, %s2403_s21   ;;  %s274_s26 = scalar_lea.vmem [#allocation11], %s2585_s22 }
  0x92   : > { %s271_s12 = scalar_lea.sflag [#allocation12], %s270_s25 }
  0x93   : > { %2286 = dma.done.wait (%p2825_p8), %s271_s12, 128  }
  0x94   : > { %2288 = vsyncadd (%p2825_p8), %s271_s12, 4294967168  ;;  %p2826_p11 = scmp.eq.s32.totalorder %s2403_s21, 0 }
  0x96   : > { %2290 = dma.done.wait (%p2826_p11), [#allocation12], 6144   ;;  %p2827_p2 = pmov %p2826_p11 }
  0x98   : > { %2292 = vsyncadd (%p2827_p2), [#allocation12], 4294961152  ;;  %p2828_p12 = pmov %p2827_p2 }
  0x99   : > { %p2829_p0 = pmov %p2827_p2 }
  0x9a   : > { %2294 = dma.done.wait (%p2828_p12), [#allocation15], 2048  }
  0x9b   : > { %2296 = vsyncadd (%p2829_p0), [#allocation15], 4294965248  ;;  %v2333_v0 = vmov 0.0|0.0   ;;  %vm2334_vm0 = vmmov 0   ;;  %v2335_v1 = vmov 0.0   ;;  %v320_v2 = vld [vmem:[#allocation13 + $0x8] sm:$0xff] }
  0x9c   : > { %1885 = vmatprep.subr.bf16.mxu0 %v2333_v0  ;;  %1737 = vmatprep.mubr.msk.f32.mxu0 %vm2334_vm0, %v2335_v1  ;;  %v321_v3 = vld [vmem:[#allocation13 + $0x20] sm:$0xff]  ;;  %v322_v4 = vld [vmem:[#allocation13 + $0x38] sm:$0xff]  ;;  %v323_v6 = vld [vmem:[#allocation13 + $0x50] sm:$0xff]  ;;  %vm598_vm1 = vcmask 64512   ;;  %s2336_s21 = smov 120   ;;  %s2338_s23 = smov 112  }
  0x9d   : > { %1909 = vmatprep.subr.bf16.mxu1 %v2333_v0  ;;  %1772 = vmatprep.mubr.msk.f32.mxu1 %vm2334_vm0, %v2335_v1  ;;  %v1886_v5 = vpack.c.bf16 %v321_v3, %v320_v2  ;;  %v1889_v7 = vpack.c.bf16 %v323_v6, %v322_v4  ;;  %v324_v8 = vld [vmem:[#allocation13 + $0x68] sm:$0xff]  ;;  %v325_v9 = vld [vmem:[#allocation13 + $0x80] sm:$0xff]  ;;  %v326_v11 = vld [vmem:[#allocation13 + $0x98] sm:$0xff]  ;;  %s2341_s14 = smov 104   ;;  %s2343_s8 = smov 8   ;;  %vm1304_vm2 = vcmask 130048  }
  0x9e   : > { %v1892_v10 = vpack.c.bf16 %v325_v9, %v324_v8  ;;  %v327_v12 = vld [vmem:[#allocation13 + $0xb0] sm:$0xff]  ;;  %v328_v14 = vld [vmem:[#allocation13 + $0xc8] sm:$0xff]  ;;  %v329_v17 = vld [vmem:[#allocation13 + $0xe0] sm:$0xff]  ;;  %s2344_s5 = smov 16   ;;  %s2345_s6 = smov 24   ;;  %vm1306_vm3 = vcmask 195584  }
  0x9f   : > { %1887 = vmatpush3.bf16.msra.mxu0 %v1886_v5  ;;  %v1895_v13 = vpack.c.bf16 %v327_v12, %v326_v11  ;;  %v406_v15 = vld [vmem:[#allocation13 + $0x10] sm:$0xff]  ;;  %v407_v16 = vld [vmem:[#allocation13 + $0x28] sm:$0xff]  ;;  %v408_v19 = vld [vmem:[#allocation13 + $0x40] sm:$0xff]  ;;  %v1898_v22 = vpack.c.bf16 %v329_v17, %v328_v14  ;;  %vm1308_vm4 = vcmask 261120   ;;  %s311_s13 = scalar_lea.vmem [#allocation16], %s2585_s22  ;;  %s1618_s30 = sshll.u32 %s2315_s18, 7 }
  0xa0   : > { %1888 = vmatprep.subr.bf16.mxu0 %v2333_v0  ;;  %v1910_v18 = vpack.c.bf16 %v407_v16, %v406_v15  ;;  %v409_v20 = vld [vmem:[#allocation13 + $0x58] sm:$0xff]  ;;  %v410_v23 = vld [vmem:[#allocation13 + $0x70] sm:$0xff]  ;;  %v411_v24 = vld [vmem:[#allocation13 + $0x88] sm:$0xff]  ;;  %s1455_s3 = sshll.u32 %s311_s13, 4  ;;  %s2755_s28 = scalar_lea.hbm %s2806_s4, %s1618_s30  ;;  %s2750_s3 = int_to_ptr.vmem [resolvable:$true] %s1455_s3 }
  0xa1   : > { %v1913_v21 = vpack.c.bf16 %v409_v20, %v408_v19  ;;  %v330_v25 = vld [vmem:[#allocation13 + $0xf8] sm:$0xff]  ;;  %v331_v26 = vld [vmem:[#allocation13 + $0x110] sm:$0xff]  ;;  %v1916_v27 = vpack.c.bf16 %v411_v24, %v410_v23  ;;  %v412_v29 = vld [vmem:[#allocation13 + $0xa0] sm:$0xff]  ;;  %v2337_v24 = vmov 0   ;;  %s1441_s9 = scalar_lea.sflag [#allocation10], %s2582_s2  ;;  %p2830_p6 = scmp.ne.s32.totalorder %s2822_s29, 0 }
  0xa2   : > { %1911 = vmatpush3.bf16.msra.mxu1 %v1910_v18  ;;  %v1901_v28 = vpack.c.bf16 %v331_v26, %v330_v25  ;;  %v413_v30 = vld [vmem:[#allocation13 + $0xb8] sm:$0xff]  ;;  %v332_v31 = vld [vmem:[#allocation13 + $0x128] sm:$0xff]  ;;  %v333_v32 = vld [vmem:[#allocation13 + $0x140] sm:$0xff]  ;;  %2086 = vset.pattern.permute.xlu0 %v2337_v24  ;;  %s2346_s18 = smov [#allocation16]  }
  0xa3   : > { %1890 = vmatpush3.bf16.msra.mxu0 %v1889_v7  ;;  %1912 = vmatprep.subr.bf16.mxu1 %v2333_v0  ;;  %v1919_v33 = vpack.c.bf16 %v413_v30, %v412_v29  ;;  %v1904_v34 = vpack.c.bf16 %v333_v32, %v332_v31  ;;  %v414_v35 = vld [vmem:[#allocation13 + $0xd0] sm:$0xff]  ;;  %v415_v36 = vld [vmem:[#allocation13 + $0xe8] sm:$0xff]  ;;  %v334_v37 = vld [vmem:[#allocation13 + $0x158] sm:$0xff]  ;;  %s2233_s22 = sshll.u32 %s2346_s18, 4  ;;  %s2234_s22 = int_to_ptr.vmem [resolvable:$false] %s2233_s22 }
  0xa4   : > { %1891 = vmatprep.subr.bf16.mxu0 %v2333_v0  ;;  %v335_v38 = vld [vmem:[#allocation13 + $0x170] sm:$0xff]  ;;  %v1922_v39 = vpack.c.bf16 %v415_v36, %v414_v35  ;;  %v416_v41 = vld [vmem:[#allocation13 + $0x100] sm:$0xff]  ;;  %v417_v42 = vld [vmem:[#allocation13 + $0x118] sm:$0xff]  ;;  %s2235_s25 = scalar_lea.vmem %s2234_s22, 256  ;;  %p2236_p4 = scmp.lt.s32.totalorder %s2750_s3, %s2234_s22 }
  0xa5   : > { %v1907_v40 = vpack.c.bf16 %v335_v38, %v334_v37  ;;  %v501_v43 = vld [vmem:[#allocation13] sm:$0xff]  ;;  %v502_v44 = vld [vmem:[#allocation13 + $0x18] sm:$0xff]  ;;  %v1925_v45 = vpack.c.bf16 %v417_v42, %v416_v41  ;;  %v418_v48 = vld [vmem:[#allocation13 + $0x130] sm:$0xff] }
  0xa6   : > { %1914 = vmatpush3.bf16.msra.mxu1 %v1913_v21  ;;  %v319_v46 = vld [vmem:[%s274_s26] sm:$0xff]  ;;  %v1934_v47 = vpack.c.bf16 %v502_v44, %v501_v43  ;;  %v419_v49 = vld [vmem:[#allocation13 + $0x148] sm:$0xff]  ;;  %v420_v54 = vld [vmem:[#allocation13 + $0x160] sm:$0xff] }
  0xa7   : > { %1893 = vmatpush3.bf16.msra.mxu0 %v1892_v10  ;;  %1915 = vmatprep.subr.bf16.mxu1 %v2333_v0  ;;  %v503_v50 = vld [vmem:[#allocation13 + $0x30] sm:$0xff]  ;;  %v504_v51 = vld [vmem:[#allocation13 + $0x48] sm:$0xff]  ;;  %v1928_v52 = vpack.c.bf16 %v419_v49, %v418_v48  ;;  %v421_v55 = vld [vmem:[#allocation13 + $0x178] sm:$0xff] }
  0xa8   : > { %1894 = vmatprep.subr.bf16.mxu0 %v2333_v0  ;;  %v1937_v53 = vpack.c.bf16 %v504_v51, %v503_v50  ;;  %v505_v56 = vld [vmem:[#allocation13 + $0x60] sm:$0xff]  ;;  %v506_v57 = vld [vmem:[#allocation13 + $0x78] sm:$0xff]  ;;  %v1931_v58 = vpack.c.bf16 %v421_v55, %v420_v54  ;;  %v507_v60 = vld [vmem:[#allocation13 + $0x90] sm:$0xff] }
  0xa9   : > { %v1940_v59 = vpack.c.bf16 %v506_v57, %v505_v56  ;;  %v508_v61 = vld [vmem:[#allocation13 + $0xa8] sm:$0xff]  ;;  %v509_v63 = vld [vmem:[#allocation13 + $0xc0] sm:$0xff]  ;;  %v510_v2 = vld [vmem:[#allocation13 + $0xd8] sm:$0xff] }
  0xaa   : > { %1917 = vmatpush3.bf16.msra.mxu1 %v1916_v27  ;;  %v1943_v62 = vpack.c.bf16 %v508_v61, %v507_v60  ;;  %v1946_v3 = vpack.c.bf16 %v510_v2, %v509_v63  ;;  %v511_v4 = vld [vmem:[#allocation13 + $0xf0] sm:$0xff]  ;;  %v512_v5 = vld [vmem:[#allocation13 + $0x108] sm:$0xff]  ;;  %v513_v7 = vld [vmem:[#allocation13 + $0x120] sm:$0xff] }
  0xab   : > { %1896 = vmatpush3.bf16.msra.mxu0 %v1895_v13  ;;  %1918 = vmatprep.subr.bf16.mxu1 %v2333_v0  ;;  %v1949_v6 = vpack.c.bf16 %v512_v5, %v511_v4  ;;  %v514_v8 = vld [vmem:[#allocation13 + $0x138] sm:$0xff]  ;;  %v515_v10 = vld [vmem:[#allocation13 + $0x150] sm:$0xff]  ;;  %v516_v11 = vld [vmem:[#allocation13 + $0x168] sm:$0xff] }
  0xac   : > { %1897 = vmatprep.subr.bf16.mxu0 %v2333_v0  ;;  %v1952_v9 = vpack.c.bf16 %v514_v8, %v513_v7  ;;  %v1955_v12 = vpack.c.bf16 %v516_v11, %v515_v10  ;;  %v500_v13 = vld [vmem:[%s265_s27] sm:$0xff]  ;;  %s2229_s27 = scalar_lea.vmem %s2750_s3, 128 }
  0xad   : > { %p2230_p1 = scmp.ne.s32.totalorder %s2750_s3, %s2229_s27  ;;  %p2237_p9 = scmp.lt.s32.totalorder %s2235_s25, %s2229_s27 }
  0xae   : > { %1920 = vmatpush3.bf16.msra.mxu1 %v1919_v33 }
  0xaf   : > { %1899 = vmatpush3.bf16.msra.mxu0 %v1898_v22  ;;  %1921 = vmatprep.subr.bf16.mxu1 %v2333_v0  ;;  %p2231_p10 = pnand %p2230_p1, %p2830_p6  ;;  %p2238_p5 = por %p2237_p9, %p2236_p4 }
  0xb0   : > { %1900 = vmatprep.subr.bf16.mxu0 %v2333_v0 }
  0xb1   : > { %p2232_p3 = pneg %p2231_p10 }
  0xb2   : > { %1923 = vmatpush3.bf16.msra.mxu1 %v1922_v39  ;;  %v2339_v39 = vmov 8  }
  0xb3   : > { %1902 = vmatpush3.bf16.msra.mxu0 %v1901_v28  ;;  %1924 = vmatprep.subr.bf16.mxu1 %v2333_v0  ;;  %p2239_p7 = pnand %p2238_p5, %p2232_p3 }
  0xb4   : > { %1903 = vmatprep.subr.bf16.mxu0 %v2333_v0  ;;  %2087 = vset.pattern.permute.xlu1 %v2339_v39 }
  0xb6   : > { %1926 = vmatpush3.bf16.msra.mxu1 %v1925_v45 }
  0xb7   : > { %1905 = vmatpush3.bf16.msra.mxu0 %v1904_v34  ;;  %1927 = vmatprep.subr.bf16.mxu1 %v2333_v0 }
  0xb8   : > { %1906 = vmatprep.subr.bf16.mxu0 %v2333_v0 }
  0xba   : > { %1929 = vmatpush3.bf16.msra.mxu1 %v1928_v52 }
  0xbb   : > { %1908 = vmatpush3.bf16.msra.mxu0 %v1907_v40  ;;  %1930 = vmatprep.subr.bf16.mxu1 %v2333_v0 }
  0xbc   : > { %1933 = vmatprep.subr.bf16.mxu0 %v2333_v0 }
  0xbe   : > { %1738 = vmatmul.mubr.f32.vlgmr.msra.gmra.mrb[0].mxu0 %v319_v46  ;;  %1932 = vmatpush3.bf16.msra.mxu1 %v1931_v58 }
  0xbf   : > { %1935 = vmatpush3.bf16.msra.mxu0 %v1934_v47  ;;  %1807 = vmatprep.mubr.msk.f32.mxu0 %vm2334_vm0, %v2335_v1 }
  0xc0   : > { %1936 = vmatprep.subr.bf16.mxu0 %v2333_v0  ;;  %1810 = vmatprep.subr.mxu1 %v2335_v1 }
  0xc1   : > { %1773 = vmatmul.mubr.f32.vlgmr.msra.gmra.mrb[0].mxu1 %v319_v46 }
  0xc2   : > { %1812 = vmatprep.mubr.msk.f32.mxu1 %vm2334_vm0, %v2335_v1 }
  0xc3   : > { %1938 = vmatpush3.bf16.msra.mxu0 %v1937_v53  ;;  %v2340_v53 = vmov 16  }
  0xc4   : > { %1939 = vmatprep.subr.bf16.mxu0 %v2333_v0 }
  0xc7   : > { %1941 = vmatpush3.bf16.msra.mxu0 %v1940_v59 }
  0xc8   : > { %1942 = vmatprep.subr.bf16.mxu0 %v2333_v0 }
  0xcb   : > { %1944 = vmatpush3.bf16.msra.mxu0 %v1943_v62 }
  0xcc   : > { %1945 = vmatprep.subr.bf16.mxu0 %v2333_v0 }
  0xcf   : > { %1947 = vmatpush3.bf16.msra.mxu0 %v1946_v3 }
  0xd0   : > { %1948 = vmatprep.subr.bf16.mxu0 %v2333_v0 }
  0xd3   : > { %1950 = vmatpush3.bf16.msra.mxu0 %v1949_v6  ;;  %v2342_v6 = vmov 24  }
  0xd4   : > { %1951 = vmatprep.subr.bf16.mxu0 %v2333_v0 }
  0xd7   : > { %1953 = vmatpush3.bf16.msra.mxu0 %v1952_v9 }
  0xd8   : > { %1954 = vmatprep.subr.bf16.mxu0 %v2333_v0 }
  0xdb   : > { %1956 = vmatpush3.bf16.msra.mxu0 %v1955_v12 }
  0xdc   : > { %1957 = vmatprep.subr.bf16.mxu0 %v2333_v0 }
  0xde   : > { %1808 = vmatmul.mubr.f32.vlgmr.msra.gmra.mrb[2].mxu0 %v500_v13 }
  0xdf   : > { %1882 = vmatprep.mubr.msk.f32.mxu0 %vm2334_vm0, %v2335_v1 }
 0x191   : > { %v2647_v14 = vpop.f32.mrb[0].mxu0 }
 0x192   : > { %v1739_v15 = vpop.f32.mrb[1].mxu0  ;;  %773 = vrot.lane.b32.xlu1 %v2647_v14, %s2336_s21  ;;  %1811 = vmatpush3.xpose.msk.msra.mxu1 %vm598_vm1, %v2647_v14 }
 0x193   : > { %1815 = vmatprep.subr.mxu1 %v2335_v1 }
 0x194   : > { %v2653_v16 = vpop.f32.mrb[0].mxu1 }
 0x195   : > { %v1774_v17 = vpop.f32.mrb[1].mxu1 }
 0x1b1   : > { %v583_v18 = vpop.f32.mrb[2].mxu0 }
 0x1b2   : > { %v2655_v19 = vmul.f32 0.17677669, %v583_v18  ;;  %v1809_v20 = vpop.f32.mrb[3].mxu0 }
 0x1b4   : > { %771 = vrot.lane.b32.xlu1 %v2655_v19, %s2336_s21  ;;  %1813 = vmatmul.mubr.msk.f32.vlgmr.msra.gmra.mrb[2].mxu1 %vm598_vm1, %v2655_v19 }
 0x1b5   : > { %1816 = vmatpush3.msra.mxu1 %v2653_v16  ;;  %1817 = vmatprep.mubr.msk.f32.mxu1 %vm2334_vm0, %v2335_v1 }
 0x1b6   : > { %1820 = vmatprep.subr.mxu1 %v2335_v1 }
 0x204   : > { %v774_v31 = vpop.permute.xlu1 %773 }
 0x226   : > { %v772_v32 = vpop.permute.xlu1 %771 }
 0x287   : > { %v671_v21 = vpop.f32.mrb[2].mxu1 }
 0x288   : > { %v1814_v22 = vpop.f32.mrb[3].mxu1  ;;  %v675_v23 = vsel %vm598_vm1, %v671_v21, -inf }
 0x289   : > { %676 = vmax.xlane.f32.xlu0 %v675_v23 }
 0x316   : > { %v2666_v25 = vpop.xlane.xlu0 %676 }
 0x317   : > { %v678_v26 = vmax.f32 %v2666_v25, -1e+30 }
 0x319   : > { %684 = vperm.xlu0 %2086, %v678_v26  }
 0x31d   : > { %873 = vrot.lane.b32.xlu0 %v2653_v16, %s2336_s21 }
 0x31e   : > { %2089 = vset.pattern.permute.xlu0 %v2342_v6 }
 0x321   : > { %951 = vrot.lane.b32.xlu0 %v2647_v14, %s2338_s23 }
 0x325   : > { %949 = vrot.lane.b32.xlu0 %v2655_v19, %s2338_s23 }
 0x398   : > { %v685_v27 = vpop.permute.xlu0 %684 }
 0x399   : > { %v687_v28 = vsub.f32 %v671_v21, %v685_v27  ;;  %v679_v21 = vsub.f32 -1e+30, %v678_v26  ;;  %v1356_v26 = vld [vmem:[#allocation14 + $0x18] sm:$0xff] }
 0x39b   : > { %v688_v29 = vmul.f32 1.442695, %v687_v28  ;;  %v680_v22 = vmul.f32 1.442695, %v679_v21 }
 0x39c   : > { %v874_v33 = vpop.permute.xlu0 %873 }
 0x39d   : > { %2095 = vpow2.f32 %v688_v29 }
 0x3a0   : > { %v952_v45 = vpop.permute.xlu0 %951 }
 0x3a4   : > { %v950_v47 = vpop.permute.xlu0 %949 }
 0x3a7   : > { %v2676_v30 = vpop.eup %2095 }
 0x3a8   : > { %1818 = vmatmul.mubr.msk.f32.vlgmr.msra.gmra.mrb[4].mxu1 %vm598_vm1, %v2676_v30  ;;  %v695_v8 = vsel %vm598_vm1, %v2676_v30, 0.0 }
 0x3a9   : > { %1821 = vmatpush3.xpose.msk.msra.mxu1 %vm598_vm1, %v774_v31  ;;  %1822 = vmatprep.mubr.msk.f32.mxu1 %vm2334_vm0, %v2335_v1  ;;  %v1353_v31 = vld [vmem:[#allocation14] sm:$0xff] }
 0x3aa   : > { %1825 = vmatprep.subr.mxu1 %v2335_v1 }
 0x3ac   : > { %1823 = vmatmul.mubr.msk.f32.vlgmr.msra.gmra.mrb[6].mxu1 %vm598_vm1, %v772_v32  ;;  %v1354_v32 = vld [vmem:[#allocation14 + $0x8] sm:$0xff] }
 0x3ad   : > { %1826 = vmatpush3.msra.mxu1 %v874_v33  ;;  %1827 = vmatprep.mubr.msk.f32.mxu1 %vm2334_vm0, %v2335_v1  ;;  %v1355_v33 = vld [vmem:[#allocation14 + $0x10] sm:$0xff]  ;;  %v1958_v25 = vpack.c.bf16 %v1354_v32, %v1353_v31 }
 0x3ae   : > { %1830 = vmatprep.subr.mxu1 %v2335_v1 }
 0x3af   : > { %1959 = vmatpush3.bf16.msra.mxu0 %v1958_v25 }
 0x3b0   : > { %1960 = vmatprep.subr.bf16.mxu0 %v2333_v0 }
 0x47b   : > { %v2688_v34 = vpop.f32.mrb[4].mxu1 }
 0x47c   : > { %v1819_v35 = vpop.f32.mrb[5].mxu1 }
 0x47d   : > { %v1961_v35 = vpack.c.bf16 %v1356_v26, %v1355_v33 }
 0x47f   : > { %v845_v36 = vpop.f32.mrb[6].mxu1  ;;  %1962 = vmatpush3.bf16.msra.mxu0 %v1961_v35 }
 0x480   : > { %v1824_v37 = vpop.f32.mrb[7].mxu1  ;;  %v849_v38 = vsel %vm598_vm1, %v845_v36, -inf  ;;  %1963 = vmatprep.subr.bf16.mxu0 %v2333_v0 }
 0x481   : > { %850 = vmax.xlane.f32.xlu1 %v849_v38  ;;  %v1358_v37 = vld [vmem:[#allocation14 + $0x28] sm:$0xff] }
 0x50e   : > { %v851_v40 = vpop.xlane.xlu1 %850 }
 0x50f   : > { %v852_v41 = vmax.f32 %v851_v40, -1e+30  ;;  %v1360_v40 = vld [vmem:[#allocation14 + $0x38] sm:$0xff] }
 0x511   : > { %858 = vperm.xlu1 %2087, %v852_v41   ;;  %v853_v7 = vsub.f32 -1e+30, %v852_v41 }
 0x513   : > { %v854_v9 = vmul.f32 1.442695, %v853_v7 }
 0x515   : > { %2088 = vset.pattern.permute.xlu1 %v2340_v53 }
 0x590   : > { %v859_v42 = vpop.permute.xlu1 %858 }
 0x591   : > { %v861_v43 = vsub.f32 %v845_v36, %v859_v42  ;;  %v1357_v36 = vld [vmem:[#allocation14 + $0x20] sm:$0xff] }
 0x592   : > { %v1964_v38 = vpack.c.bf16 %v1358_v37, %v1357_v36  ;;  %v1361_v42 = vld [vmem:[#allocation14 + $0x40] sm:$0xff] }
 0x593   : > { %v862_v44 = vmul.f32 1.442695, %v861_v43  ;;  %v1362_v43 = vld [vmem:[#allocation14 + $0x48] sm:$0xff] }
 0x594   : > { %1965 = vmatpush3.bf16.msra.mxu0 %v1964_v38 }
 0x595   : > { %2097 = vpow2.f32 %v862_v44  ;;  %1966 = vmatprep.subr.bf16.mxu0 %v2333_v0  ;;  %v1970_v44 = vpack.c.bf16 %v1362_v43, %v1361_v42 }
 0x59f   : > { %v2691_v46 = vpop.eup %2097 }
 0x5a0   : > { %1828 = vmatmul.mubr.msk.f32.vlgmr.msra.gmra.mrb[8].mxu1 %vm598_vm1, %v2691_v46 }
 0x5a1   : > { %1831 = vmatpush3.xpose.msk.msra.mxu1 %vm598_vm1, %v952_v45  ;;  %1832 = vmatprep.mubr.msk.f32.mxu1 %vm2334_vm0, %v2335_v1  ;;  %v1363_v45 = vld [vmem:[#allocation14 + $0x50] sm:$0xff] }
 0x5a2   : > { %1835 = vmatprep.subr.mxu1 %v2335_v1 }
 0x5a4   : > { %1833 = vmatmul.mubr.msk.f32.vlgmr.msra.gmra.mrb[10].mxu1 %vm598_vm1, %v950_v47 }
 0x5a5   : > { %1837 = vmatprep.mubr.msk.f32.mxu1 %vm2334_vm0, %v2335_v1 }
 0x673   : > { %v945_v48 = vpop.f32.mrb[8].mxu1 }
 0x674   : > { %v1829_v49 = vpop.f32.mrb[9].mxu1 }
 0x675   : > { %v1366_v49 = vld [vmem:[#allocation14 + $0x68] sm:$0xff] }
 0x677   : > { %v1023_v50 = vpop.f32.mrb[10].mxu1 }
 0x678   : > { %v1834_v51 = vpop.f32.mrb[11].mxu1  ;;  %v1027_v52 = vsel %vm598_vm1, %v1023_v50, -inf }
 0x679   : > { %1028 = vmax.xlane.f32.xlu0 %v1027_v52  ;;  %v1367_v51 = vld [vmem:[#allocation14 + $0x70] sm:$0xff]  ;;  %v1368_v52 = vld [vmem:[#allocation14 + $0x78] sm:$0xff] }
 0x706   : > { %v1029_v54 = vpop.xlane.xlu0 %1028 }
 0x707   : > { %v1030_v55 = vmax.f32 %v1029_v54, -1e+30 }
 0x709   : > { %1036 = vperm.xlu1 %2088, %v1030_v55   ;;  %v1031_v10 = vsub.f32 -1e+30, %v1030_v55 }
 0x70d   : > { %1050 = vrot.lane.b32.xlu1 %v2653_v16, %s2338_s23 }
 0x70e   : > { %2091 = vset.pattern.permute.xlu1 %v2339_v39  ;;  %v1359_v39 = vld [vmem:[#allocation14 + $0x30] sm:$0xff] }
 0x70f   : > { %v1967_v41 = vpack.c.bf16 %v1360_v40, %v1359_v39 }
 0x711   : > { %1128 = vrot.lane.b32.xlu1 %v2647_v14, %s2341_s14  ;;  %1968 = vmatpush3.bf16.msra.mxu0 %v1967_v41 }
 0x712   : > { %1969 = vmatprep.subr.bf16.mxu0 %v2333_v0 }
 0x715   : > { %1126 = vrot.lane.b32.xlu1 %v2655_v19, %s2341_s14  ;;  %v869_v19 = vsel %vm598_vm1, %v2691_v46, 0.0  ;;  %v1364_v46 = vld [vmem:[#allocation14 + $0x58] sm:$0xff]  ;;  %1971 = vmatpush3.bf16.msra.mxu0 %v1970_v44 }
 0x716   : > { %v1973_v47 = vpack.c.bf16 %v1364_v46, %v1363_v45  ;;  %1972 = vmatprep.subr.bf16.mxu0 %v2333_v0 }
 0x719   : > { %1974 = vmatpush3.bf16.msra.mxu0 %v1973_v47 }
 0x71a   : > { %1975 = vmatprep.subr.bf16.mxu0 %v2333_v0 }
 0x788   : > { %v1037_v56 = vpop.permute.xlu1 %1036 }
 0x789   : > { %v1039_v57 = vsub.f32 %v1023_v50, %v1037_v56 }
 0x78b   : > { %v1040_v58 = vmul.f32 1.442695, %v1039_v57 }
 0x78c   : > { %v1051_v59 = vpop.permute.xlu1 %1050 }
 0x78d   : > { %2099 = vpow2.f32 %v1040_v58  ;;  %1836 = vmatpush3.msra.mxu1 %v1051_v59 }
 0x78e   : > { %1840 = vmatprep.subr.mxu1 %v2335_v1  ;;  %2101 = vpow2.f32 %v854_v9 }
 0x790   : > { %v1129_v60 = vpop.permute.xlu1 %1128 }
 0x794   : > { %v1127_v62 = vpop.permute.xlu1 %1126 }
 0x797   : > { %v2100_v61 = vpop.eup %2099 }
 0x798   : > { %1838 = vmatmul.mubr.msk.f32.vlgmr.msra.gmra.mrb[12].mxu1 %vm598_vm1, %v2100_v61  ;;  %v2102_v11 = vpop.eup %2101  ;;  %v1047_v20 = vsel %vm598_vm1, %v2100_v61, 0.0 }
 0x799   : > { %1841 = vmatpush3.xpose.msk.msra.mxu1 %vm598_vm1, %v1129_v60  ;;  %1842 = vmatprep.mubr.msk.f32.mxu1 %vm2334_vm0, %v2335_v1 }
 0x79a   : > { %1845 = vmatprep.subr.mxu1 %v2335_v1 }
 0x79c   : > { %1843 = vmatmul.mubr.msk.f32.vlgmr.msra.gmra.mrb[14].mxu1 %vm598_vm1, %v1127_v62 }
 0x79d   : > { %1847 = vmatprep.mubr.msk.f32.mxu1 %vm2334_vm0, %v2335_v1  ;;  %v1032_v1 = vmul.f32 1.442695, %v1031_v10 }
 0x79f   : > { %2103 = vpow2.f32 %v1032_v1 }
 0x7a9   : > { %v2104_v12 = vpop.eup %2103 }
 0x86b   : > { %v1122_v63 = vpop.f32.mrb[12].mxu1 }
 0x86c   : > { %v1839_v2 = vpop.f32.mrb[13].mxu1 }
 0x86f   : > { %v1200_v3 = vpop.f32.mrb[14].mxu1 }
 0x870   : > { %v1844_v4 = vpop.f32.mrb[15].mxu1  ;;  %v1204_v5 = vsel %vm598_vm1, %v1200_v3, -inf }
 0x871   : > { %1205 = vmax.xlane.f32.xlu1 %v1204_v5 }
 0x882   : > { %1227 = vrot.lane.b32.xlu1 %v2653_v16, %s2341_s14 }
 0x8a6   : > { %696 = vadd.xlane.f32.xlu1 %v695_v8 }
 0x8b7   : > { %866 = vperm.xlu1 %2091, %v2102_v11  }
 0x8bb   : > { %2092 = vset.pattern.permute.xlu1 %v2340_v53  ;;  %v1979_v53 = vpack.c.bf16 %v1368_v52, %v1367_v51 }
 0x8bc   : > { %1044 = vperm.xlu1 %2092, %v2104_v12  }
 0x8c0   : > { %1319 = vrot.lane.b32.xlu1 %v945_v48, %s2343_s8  ;;  %v1365_v48 = vld [vmem:[#allocation14 + $0x60] sm:$0xff] }
 0x8c1   : > { %2093 = vset.pattern.permute.xlu1 %v2342_v6  ;;  %v1976_v50 = vpack.c.bf16 %v1366_v49, %v1365_v48 }
 0x8c3   : > { %1977 = vmatpush3.bf16.msra.mxu0 %v1976_v50 }
 0x8c4   : > { %1323 = vrot.lane.b32.xlu1 %v1122_v63, %s2344_s5  ;;  %1978 = vmatprep.subr.bf16.mxu0 %v2333_v0 }
 0x8c7   : > { %1980 = vmatpush3.bf16.msra.mxu0 %v1979_v53 }
 0x8fe   : > { %v1206_v13 = vpop.xlane.xlu1 %1205 }
 0x8ff   : > { %v1207_v14 = vmax.f32 %v1206_v13, -1e+30 }
 0x901   : > { %v1208_v15 = vsub.f32 -1e+30, %v1207_v14  ;;  %1213 = vperm.xlu0 %2089, %v1207_v14  }
 0x902   : > { %v1228_v16 = vpop.permute.xlu1 %1227 }
 0x903   : > { %v1209_v17 = vmul.f32 1.442695, %v1208_v15  ;;  %1846 = vmatpush3.msra.mxu1 %v1228_v16 }
 0x905   : > { %2105 = vpow2.f32 %v1209_v17  ;;  %2090 = vset.pattern.permute.xlu0 %v2337_v24 }
 0x906   : > { %2107 = vpow2.f32 %v680_v22 }
 0x90f   : > { %v2106_v18 = vpop.eup %2105 }
 0x910   : > { %1221 = vperm.xlu1 %2093, %v2106_v18   ;;  %v2108_v23 = vpop.eup %2107 }
 0x920   : > { %870 = vadd.xlane.f32.xlu0 %v869_v19 }
 0x924   : > { %1048 = vadd.xlane.f32.xlu0 %v1047_v20 }
 0x933   : > { %v697_v56 = vpop.xlane.xlu1 %696 }
 0x937   : > { %v867_v57 = vpop.permute.xlu1 %866 }
 0x93a   : > { %692 = vperm.xlu0 %2090, %v2108_v23  }
 0x93b   : > { %v1045_v58 = vpop.permute.xlu1 %1044 }
 0x93e   : > { %2094 = vset.pattern.permute.xlu0 %v2342_v6 }
 0x93f   : > { %v1320_v60 = vpop.permute.xlu1 %1319 }
 0x940   : > { %v1330_v14 = vsel %vm598_vm1, %v2688_v34, %v1320_v60 }
 0x943   : > { %v1324_v62 = vpop.permute.xlu1 %1323 }
 0x944   : > { %v1331_v16 = vsel %vm1304_vm2, %v1330_v14, %v1324_v62 }
 0x980   : > { %v1214_v27 = vpop.permute.xlu0 %1213 }
 0x981   : > { %v1216_v28 = vsub.f32 %v1200_v3, %v1214_v27 }
 0x983   : > { %v1217_v24 = vmul.f32 1.442695, %v1216_v28 }
 0x985   : > { %2109 = vpow2.f32 %v1217_v24 }
 0x98f   : > { %v2110_v29 = vpop.eup %2109  ;;  %v1222_v3 = vpop.permute.xlu1 %1221 }
 0x990   : > { %1848 = vmatmul.mubr.msk.f32.vlgmr.msra.gmra.mrb[16].mxu1 %vm598_vm1, %v2110_v29  ;;  %v1224_v30 = vsel %vm598_vm1, %v2110_v29, 0.0 }
 0x991   : > { %1225 = vadd.xlane.f32.xlu1 %v1224_v30 }
 0x9ad   : > { %v871_v59 = vpop.xlane.xlu0 %870 }
 0x9ae   : > { %v1314_v5 = vsel %vm598_vm1, %v697_v56, %v871_v59 }
 0x9b1   : > { %v1049_v61 = vpop.xlane.xlu0 %1048 }
 0x9b2   : > { %v1315_v7 = vsel %vm1304_vm2, %v1314_v5, %v1049_v61 }
 0x9b9   : > { %v693_v63 = vpop.permute.xlu0 %692 }
 0x9ba   : > { %v1310_v2 = vsel %vm598_vm1, %v693_v63, %v867_v57 }
 0x9bb   : > { %v1311_v0 = vsel %vm1304_vm2, %v1310_v2, %v1045_v58 }
 0x9bc   : > { %v1312_v6 = vsel %vm1306_vm3, %v1311_v0, %v1222_v3 }
 0x9bd   : > { %v1313_v9 = vsel %vm1308_vm4, %v1312_v6, 0.0 }
 0x9be   : > { %v1335_v1 = vmul.f32 0.0, %v1313_v9 }
 0xa1e   : > { %v1226_v4 = vpop.xlane.xlu1 %1225 }
 0xa1f   : > { %v1316_v8 = vsel %vm1306_vm3, %v1315_v7, %v1226_v4 }
 0xa20   : > { %v1317_v10 = vsel %vm1308_vm4, %v1316_v8, 1.0 }
 0xa21   : > { %v1336_v11 = vadd.f32 %v1335_v1, %v1317_v10 }
 0xa23   : > { %2111 = vrcp.f32 %v1336_v11 }
 0xa2d   : > { %v2112_v12 = vpop.eup %2111 }
 0xa2e   : > { %v1348_v13 = vmul.f32 %v2112_v12, %v1336_v11 }
 0xa30   : > { %v1349_v15 = vsub.f32 2.0, %v1348_v13 }
 0xa32   : > { %v1350_v20 = vmul.f32 %v2112_v12, %v1349_v15 }
 0xa63   : > { %v1299_v54 = vpop.f32.mrb[16].mxu1 }
 0xa64   : > { %1327 = vrot.lane.b32.xlu1 %v1299_v54, %s2345_s6  ;;  %v1849_v55 = vpop.f32.mrb[17].mxu1 }
 0xad6   : > { %v1328_v17 = vpop.permute.xlu1 %1327 }
 0xad7   : > { %v1332_v18 = vsel %vm1306_vm3, %v1331_v16, %v1328_v17 }
 0xad8   : > { %v1333_v19 = vsel %vm1308_vm4, %v1332_v18, 0.0 }
 0xad9   : > { %v1340_v21 = vadd.f32 %v1335_v1, %v1333_v19 }
 0xadb   : > { %v1352_v22 = vmul.f32 %v1350_v20, %v1340_v21 }
 0xadd   : > { %1883 = vmatmul.mubr.f32.vlgmr.msra.gmra.mrb[4].mxu0 %v1352_v22 }
 0xbb0   : > { %v1435_v34 = vpop.f32.mrb[4].mxu0 }
 0xbb1   : > { %1439 = vst [vmem:[%s311_s13] sm:$0xff] %v1435_v34  ;;  %v1884_v23 = vpop.f32.mrb[5].mxu0 }
 0xbb2   : > { %2242 = shalt.err (!%p2239_p7)
}
 0xbb3   : > { %s2243_s2 = scalar_lea.hbm %s2755_s28, 128  ;;  %s2247_s21 = scalar_lea.hbm %s2806_s4, 256 }
 0xbb4   : > { %p2244_p13 = scmp.ne.s32.totalorder %s2755_s28, %s2243_s2  ;;  %p2248_p2 = scmp.lt.u32.totalorder %s2755_s28, %s2806_s4 }
 0xbb5   : > { %p2249_p12 = scmp.lt.u32.totalorder %s2247_s21, %s2243_s2  ;;  %p2251_p1 = scmp.lt.u32.totalorder %s2243_s2, %s2755_s28 }
 0xbb6   : > { %p2245_p8 = pnand %p2244_p13, %p2830_p6 }
 0xbb7   : > { %p2250_p0 = por %p2249_p12, %p2248_p2 }
 0xbb8   : > { %p2246_p11 = pneg %p2245_p8 }
 0xbb9   : > { %p2252_p10 = por %p2251_p1, %p2250_p0 }
 0xbbb   : > { %p2253_p3 = pnand %p2252_p10, %p2246_p11 }
 0xbbd   : > { %2256 = shalt.err (!%p2253_p3)
}
 0xbbe   : > { %1993 = dma.vmem_to_hbm [thread:$0]  (%p2830_p6), %s2750_s3, 128, %s2755_s28, %s1441_s9  }
 0xbbf PF: > { %s1467_s8 = sand.u32 1, %s2303_s15   ;;  %p2831_p4 = scmp.ne.s32.totalorder %s2815_s24, 0 }
 0xbc0   : > { %p2832_p9 = scmp.ge.s32.totalorder %s2323_s20, 2  ;;  %s1468_s5 = scalar_lea.sflag [#allocation10], %s1467_s8 }
 0xbc2   : > { %p2010_p5 = pnand %p2832_p9, %p2831_p4 }
 0xbc4   : > { %2298 = dma.done.wait (!%p2010_p5), %s1468_s5, 128  }
 0xbc5   : > { %2300 = vsyncadd (!%p2010_p5), %s1468_s5, 4294967168  ;;  %s24_s20 = sadd.s32 1, %s2323_s20   ;;  %s2833_s29 = sld [smem:[#allocation22_spill]] }
 0xbc6   : > { %p21_p7 = scmp.ge.s32.totalorder %s24_s20, 4   ;;  %s2834_s15 = smov %s2307_s16 }
 0xbc7   : > { %s2835_s16 = smov %s2311_s17  ;;  %s2836_s17 = smov %s2512_s7 }
 0xbc8   : > { %s2837_s18 = smov %s2319_s19  ;;  %23 = sbr.rel (!%p21_p7) target bundleno = 12 (0xc), region = 118 }
 0xbcb   : > { %s2838_s19 = smov %s2833_s29 }
 0xbcf   :  { %1473 = vsyncpa [#allocation9], 1 }
 0xbd0   :  { %1475 = vsyncpa [#allocation9 + $0x1], 1 }
 0xbd1   :  { %1476 = vsyncpa [#allocation12], 1 }
 0xbd2   :  { %1478 = vsyncpa [#allocation12 + $0x1], 1 }
 0xbd3   :  { %1479 = vsyncpa [#allocation15], 1 }
 0xbd4   :  { %1480 = vsyncpa [#allocation10], 1 }
 0xbd5   :  { %1482 = vsyncpa [#allocation10 + $0x1], 1 }

</bundles_post_ra>
